<compile_context>
chip_gen: v7x
topology: tpu7x:2x2x1
jax: 0.10.0
libtpu: 0.0.40
codegen_flags: <defaults>
</compile_context>

<pallas_src>
import math
import jax
import jax.numpy as jnp
from jax import lax
from jax.experimental import pallas as pl
from jax.experimental.pallas import tpu as pltpu


# ----------------------------- config (cfg.*) -------------------------------
class cfg:
    dist_loss_weight = 0.01
    presd_loss_weight = 0.1
    resd_loss_weight = 0.1
    resd_loss_weight_gamma = 0.5
    resd_loss_weight_milestone = 1000
    eikonal_loss_weight = 0.1
    observed_eikonal_loss_weight = 0.1
    norm_loss_weight = 0.01
    sem_loss_weight = 0.1
    msk_loss_weight = 0.01
    img_loss_weight = 1.0


def anneal_loss_weight(weight, gamma, iter_step, milestone):
    if isinstance(iter_step, (int, float)):
        return weight * (gamma ** (float(iter_step) / float(milestone)))
    return weight * (gamma ** (jnp.asarray(iter_step, jnp.float32) / float(milestone)))


# Loss slot layout: outputs 0..8 are per-loss values, slot 9 the weighted total.
#   0 dist, 1 presd, 2 resd, 3 grad(eik), 4 ograd(eik),
#   5 norm, 6 sem(CE), 7 msk(soft-IoU), 8 img(MSE)
_LOSS_NAMES = ('dist', 'presd', 'resd', 'grad', 'ograd', 'norm', 'sem', 'msk', 'rgb')
_NUM_LOSS = len(_LOSS_NAMES)
_NUM_OUT = _NUM_LOSS + 1           # + combined weighted loss
_ACC_ROWS = 16                     # lane-wise accumulator rows (10 used)
# accumulator rows: 0..6 same as loss slots 0..6, 7 IoU-inter, 8 IoU-union, 9 MSE-sum
(CNT_DIST, CNT_PRESD, CNT_RESD, CNT_GRAD, CNT_OGRAD,
 CNT_NORM, CNT_SEM, CNT_MSK, CNT_RGB) = range(_NUM_LOSS)


# ------------------------------- fused kernel --------------------------------
def _make_fused_loss_kernel(layout, flags, rgb_channels):
    """Specialize the kernel on static row layout + presence flags."""
    flags_list = [flags[n] for n in _LOSS_NAMES]

    def kernel(counts_ref, weights_ref, slab_ref, out_ref, acc_ref):
        i = pl.program_id(0)
        tile = slab_ref.shape[1]

        @pl.when(i == 0)
        def _init():
            acc_ref[...] = jnp.zeros_like(acc_ref)

        def rows(name):                       # static sublane slice of the slab
            s, c = layout[name]
            return slab_ref[s:s + c, :]

        def add(row, partial):                # accumulate a (1, tile) lane partial
            acc_ref[row:row + 1, :] = acc_ref[row:row + 1, :] + partial

        def rownorm(x):                       # (C, tile) -> (1, tile)
            return jnp.sqrt(jnp.sum(x * x, axis=0, keepdims=True))

        # column indices only needed by the masked terms (eikonal / cross-entropy)
        if flags['grad'] or flags['ograd'] or flags['sem']:
            col = i * tile + lax.broadcasted_iota(jnp.int32, (1, tile), 1)

        if flags['dist']:
            add(0, rows('dist'))
        if flags['presd']:
            add(1, rownorm(rows('presd')))
        if flags['resd']:
            add(2, rownorm(rows('resd')))
        if flags['grad']:
            gn = rownorm(rows('grad'))
            m = (col < counts_ref[CNT_GRAD]).astype(jnp.float32)
            add(3, (gn - 1.0) * (gn - 1.0) * m)
        if flags['ograd']:
            ogn = rownorm(rows('ograd'))
            m = (col < counts_ref[CNT_OGRAD]).astype(jnp.float32)
            add(4, (ogn - 1.0) * (ogn - 1.0) * m)
        if flags['norm']:
            # zero-padded lanes give view_dot == 0 -> contribute 0, no mask needed
            eps = jnp.float32(1e-8)
            nm = rows('nm')
            nn = rows('nn')
            vd = rows('vd')
            nm = nm * lax.rsqrt(jnp.sum(nm * nm, axis=0, keepdims=True) + eps)
            nn = nn * lax.rsqrt(jnp.sum(nn * nn, axis=0, keepdims=True) + eps)
            view_dot = jnp.clip(jnp.sum(nm * (-vd), axis=0, keepdims=True), 0.0, 1.0)
            per = (jnp.sum(jnp.abs(nm - nn), axis=0, keepdims=True)
                   + (1.0 - jnp.sum(nm * nn, axis=0, keepdims=True))) * view_dot
            add(5, per)
        if flags['sem']:
            logits = rows('sem')                          # (C, tile): classes on sublanes
            lbl = rows('lbl').astype(jnp.int32)           # (1, tile)
            mx = jnp.max(logits, axis=0, keepdims=True)
            lse = jnp.log(jnp.sum(jnp.exp(logits - mx), axis=0, keepdims=True)) + mx
            cls = lax.broadcasted_iota(jnp.int32, logits.shape, 0)
            onehot = (cls == lbl).astype(jnp.float32)
            picked = jnp.sum(onehot * logits, axis=0, keepdims=True)
            m = (col < counts_ref[CNT_SEM]).astype(jnp.float32)
            add(6, (lse - picked) * m)
        if flags['msk']:
            a = rows('accm')
            mm = rows('mskm')
            add(7, a * mm)                                # soft intersection
            add(8, a + mm - a * mm)                       # soft union
        if flags['rgb']:
            d = rows('rgbp') - rows('rgbg')
            add(9, jnp.sum(d * d, axis=0, keepdims=True))

        @pl.when(i == pl.num_programs(0) - 1)
        def _finalize():
            def total(row):                               # single cross-lane reduce
                return jnp.sum(acc_ref[row:row + 1, :])

            def cnt(k):
                return jnp.maximum(counts_ref[k], 1).astype(jnp.float32)

            losses = [jnp.float32(0.0)] * _NUM_LOSS
            if flags['dist']:
                losses[0] = total(0) / cnt(CNT_DIST)
            if flags['presd']:
                losses[1] = total(1) / cnt(CNT_PRESD)
            if flags['resd']:
                losses[2] = total(2) / cnt(CNT_RESD)
            if flags['grad']:
                losses[3] = total(3) / cnt(CNT_GRAD)
            if flags['ograd']:
                losses[4] = total(4) / cnt(CNT_OGRAD)
            if flags['norm']:
                losses[5] = total(5) / cnt(CNT_NORM)
            if flags['sem']:
                losses[6] = total(6) / cnt(CNT_SEM)
            if flags['msk']:
                losses[7] = 1.0 - total(7) / (total(8) + 1e-8)
            if flags['rgb']:
                losses[8] = total(9) / (cnt(CNT_RGB) * float(rgb_channels))

            loss = jnp.float32(0.0)
            for k in range(_NUM_LOSS):
                out_ref[k] = losses[k]
                if flags_list[k]:
                    loss = loss + weights_ref[k] * losses[k]
            out_ref[_NUM_LOSS] = loss

    return kernel


def _fused_loss_call(slab, counts, weights, layout, flags, rgb_channels, tile_n):
    n_rows, n_pad = slab.shape
    assert n_pad % tile_n == 0 and n_rows % 8 == 0
    grid = (n_pad // tile_n,)
    kernel = _make_fused_loss_kernel(layout, flags, rgb_channels)
    return pl.pallas_call(
        kernel,
        out_shape=jax.ShapeDtypeStruct((_NUM_OUT,), jnp.float32),
        grid_spec=pltpu.PrefetchScalarGridSpec(
            num_scalar_prefetch=1,                          # per-loss row counts (i32)
            grid=grid,
            in_specs=[
                pl.BlockSpec(memory_space=pltpu.SMEM),      # loss weights (9,) f32
                pl.BlockSpec((n_rows, tile_n), lambda i, cnt: (0, i)),  # packed slab
            ],
            out_specs=pl.BlockSpec(memory_space=pltpu.SMEM),
            scratch_shapes=[pltpu.VMEM((_ACC_ROWS, tile_n), jnp.float32)],
        ),
        compiler_params=pltpu.CompilerParams(
            dimension_semantics=("arbitrary",),             # sequential reduction axis
            vmem_limit_bytes=48 * 1024 * 1024),
    )(counts, weights, slab)


# ----------------------------- host-side layout -------------------------------
def _round_up(x, m):
    return ((x + m - 1) // m) * m


def _rows2d(x, c):
    """[..., c] -> (n_rows, c) float32 (rows flattened)."""
    return x.reshape(-1, c).astype(jnp.float32)


# ------------------------- NetworkWrapper.forward -----------------------------
def network_wrapper_forward(ret, batch, tile_n=4096, single_step_max=8192):
    has = {
        'dist':  'distortion' in ret,
        'presd': 'presd' in ret,
        'resd':  'residuals' in ret,
        'grad':  'gradients' in ret,
        'ograd': 'observed_gradients' in ret and ret['observed_gradients'].size > 0,
        'norm':  'norm_map' in ret and 'norm' in batch,
        'sem':   'sem_map' in ret and 'sem' in batch,
        'msk':   'acc_map' in ret and 'msk' in batch,
        'rgb':   'rgb_map' in ret,
    }
    assert any(has.values()), "no renderer outputs to aggregate"

    # ---- collect present features as (name, rows2d, channels) ----------------
    feats = []
    feat_rows = {}

    def add_feat(name, arr, c):
        a2 = _rows2d(arr, c)
        feats.append((name, a2, c))
        feat_rows[name] = a2.shape[0]

    if has['dist']:
        add_feat('dist', ret['distortion'], 1)
    if has['presd']:
        add_feat('presd', ret['presd'], 3)
    if has['resd']:
        add_feat('resd', ret['residuals'], ret['residuals'].shape[-1])
    if has['grad']:
        add_feat('grad', ret['gradients'], 3)
    if has['ograd']:
        add_feat('ograd', ret['observed_gradients'], 3)
    if has['norm']:
        add_feat('nm', ret['norm_map'], 3)
        add_feat('nn', batch['norm'], 3)
        add_feat('vd', batch['ray_d'], 3)
    if has['sem']:
        add_feat('sem', ret['sem_map'], ret['sem_map'].shape[-1])
        add_feat('lbl', batch['sem'].astype(jnp.float32), 1)   # exact for small ints
    if has['msk']:
        add_feat('accm', ret['acc_map'], 1)
        add_feat('mskm', batch['msk'], 1)
    if has['rgb']:
        add_feat('rgbp', ret['rgb_map'], 3)
        add_feat('rgbg', batch['rgb'], 3)

    # ---- choose tiling (single grid step unless N is large) -------------------
    n_max = max(feat_rows.values())
    if n_max <= single_step_max:
        tile_n = _round_up(max(n_max, 128), 128)
        n_pad = tile_n
    else:
        tile_n = max(128, (tile_n // 128) * 128)
        n_pad = _round_up(n_max, tile_n)

    # ---- pack everything into ONE channel-major slab ---------------------------
    # Features sharing a row count are concatenated on the channel axis first, so
    # each group costs one concatenate + one transpose + one pad.
    groups = {}
    for name, a2, c in feats:
        groups.setdefault(a2.shape[0], []).append((name, a2, c))

    layout = {}
    parts = []
    row = 0
    for n, items in groups.items():
        cat = jnp.concatenate([a for (_, a, _) in items], axis=1)   # (n, Cg)
        cm = jnp.pad(cat.T, ((0, 0), (0, n_pad - n)))               # (Cg, n_pad)
        parts.append(cm)
        for name, _, c in items:
            layout[name] = (row, c)
            row += c
    rows_pad = _round_up(max(row, 8), 8)
    slab = jnp.concatenate(parts, axis=0) if len(parts) > 1 else parts[0]
    if slab.shape[0] < rows_pad:
        slab = jnp.pad(slab, ((0, rows_pad - slab.shape[0]), (0, 0)))

    # ---- per-loss row counts (scalar prefetch, exact per-array denominators) ---
    cnt_src = {'dist': 'dist', 'presd': 'presd', 'resd': 'resd', 'grad': 'grad',
               'ograd': 'ograd', 'norm': 'nm', 'sem': 'sem', 'msk': 'accm',
               'rgb': 'rgbp'}
    cnts = [feat_rows.get(cnt_src[n], 0) if has[n] else 0 for n in _LOSS_NAMES]
    counts = jnp.asarray(cnts, jnp.int32)

    # ---- loss weights (combined inside the kernel) ------------------------------
    w = [0.0] * _NUM_LOSS
    resd_w = None
    if has['dist']:
        w[0] = cfg.dist_loss_weight
    if has['presd']:
        w[1] = cfg.presd_loss_weight
    if has['resd']:
        resd_w = anneal_loss_weight(cfg.resd_loss_weight, cfg.resd_loss_weight_gamma,
                                    batch['meta']['iter_step'],
                                    cfg.resd_loss_weight_milestone)
        w[2] = resd_w
    if has['grad']:
        w[3] = cfg.eikonal_loss_weight
    if has['ograd']:
        w[4] = cfg.observed_eikonal_loss_weight
    if has['norm']:
        w[5] = cfg.norm_loss_weight
    if has['sem']:
        w[6] = cfg.sem_loss_weight
    if has['msk']:
        w[7] = cfg.msk_loss_weight
    if has['rgb']:
        w[8] = cfg.img_loss_weight
    weights = jnp.stack([jnp.asarray(x, jnp.float32) for x in w])

    rgb_channels = layout['rgbp'][1] if has['rgb'] else 3

    # ---- single fused kernel launch --------------------------------------------
    out = _fused_loss_call(slab, counts, weights, layout, has, rgb_channels, tile_n)

    # ---- stats / return ---------------------------------------------------------
    scalar_stats = {}
    if has['dist']:
        scalar_stats['dist_loss'] = out[0]
    if has['presd']:
        scalar_stats['presd_loss'] = out[1]
    # TODO(synk): 'oresd'/'jac'/'ograd'/'cgrad' reg_raw_crit terms: definition
    #             unavailable in the reference repo; skipped.
    if has['resd']:
        scalar_stats['resd_loss'] = out[2]
        if cfg.resd_loss_weight_gamma != 1.0:
            scalar_stats['resd_loss_weight'] = jnp.asarray(resd_w, jnp.float32)
    if has['grad']:
        scalar_stats['grad_loss'] = out[3]
    if has['ograd']:
        scalar_stats['ograd_loss'] = out[4]
    if has['norm']:
        scalar_stats['norm_loss'] = out[5]
    if has['sem']:
        scalar_stats['sem_loss'] = out[6]
    if has['msk']:
        scalar_stats['msk_loss'] = out[7]
    if has['rgb']:
        img_loss = out[8]
        scalar_stats['img_loss'] = img_loss
        scalar_stats['psnr'] = (jnp.log(1.0 / jnp.maximum(img_loss, 1e-10))
                                * 10.0 / math.log(10.0))
    loss = out[_NUM_LOSS]
    scalar_stats['loss'] = loss
    image_stats = {}
    return ret, loss, scalar_stats, image_stats


# --------------------------------- main ---------------------------------------
if __name__ == "__main__":
    key = jax.random.PRNGKey(0)
    ks = jax.random.split(key, 16)

    B, R, C = 2, 128, 8            # batch rays, samples/pixels per batch, sem classes
    N = B * R                       # flattened rows

    # Synthetic renderer outputs (stand-in for self.renderer.render(batch)).
    ret = {
        'distortion':         jax.random.uniform(ks[0], (B, R), jnp.float32),
        'presd':              0.01 * jax.random.normal(ks[1], (B, R, 3), jnp.float32),
        'residuals':          0.01 * jax.random.normal(ks[2], (B, R, 3), jnp.float32),
        'gradients':          jax.random.normal(ks[3], (B, R, 3), jnp.float32),
        'observed_gradients': jax.random.normal(ks[4], (B, R // 2, 3), jnp.float32),
        'norm_map':           jax.random.normal(ks[5], (B, R, 3), jnp.float32),
        'sem_map':            jax.random.normal(ks[6], (N, C), jnp.float32),
        'acc_map':            jax.random.uniform(ks[7], (B, R), jnp.float32),
        'rgb_map':            jax.random.uniform(ks[8], (B, R, 3), jnp.float32),
    }

    ray_d = jax.random.normal(ks[9], (B, R, 3), jnp.float32)
    ray_d = ray_d / jnp.linalg.norm(ray_d, axis=-1, keepdims=True)

    batch = {
        'norm':  jax.random.normal(ks[10], (B, R, 3), jnp.float32),
        'ray_d': ray_d,
        'sem':   jax.random.randint(ks[11], (N,), 0, C, jnp.int32),
        'msk':   (jax.random.uniform(ks[12], (B, R), jnp.float32) > 0.5).astype(jnp.float32),
        'rgb':   jax.random.uniform(ks[13], (B, R, 3), jnp.float32),
        'meta':  {'iter_step': 500},
    }

    # Default config: single grid step (all rows in one lane-dense tile).
    _, loss1, stats1, _ = network_wrapper_forward(ret, batch)
    # Forced multi-step config exercises the accumulate/finalize pipeline.
    _, loss2, stats2, _ = network_wrapper_forward(ret, batch, tile_n=128, single_step_max=0)
    jax.block_until_ready((loss1, loss2, stats1, stats2))

    assert bool(jnp.isfinite(loss1)) and bool(jnp.isfinite(loss2))
    assert bool(jnp.allclose(loss1, loss2, rtol=1e-3, atol=1e-5)), (loss1, loss2)
    print("KERNEL_OK")
</pallas_src>

<mosaic_0001>
module attributes {stable_mosaic.version = 11 : i64} {
  func.func @kernel(%arg0: i32, %arg1: memref<9xi32, #tpu.memory_space<smem>>, %arg2: memref<9xf32, #tpu.memory_space<smem>>, %arg3: memref<40x256xf32, #tpu.memory_space<vmem>>, %arg4: memref<10xf32, #tpu.memory_space<smem>>, %arg5: memref<16x256xf32, #tpu.memory_space<vmem>>) attributes {dimension_semantics = [#tpu.dimension_semantics<arbitrary>], iteration_bounds = array<i64: 1>, scalar_prefetch = 1 : i64, scratch_operands = 1 : i64, tpu.core_type = #tpu.core_type<tc>, window_params = [{transform_indices = @transform_0, window_bounds = array<i64: 9>}, {transform_indices = @transform_1, window_bounds = array<i64: 40, 256>}, {transform_indices = @transform_2, window_bounds = array<i64: 10>}]} {
    %c0_i32 = arith.constant 0 : i32
    %0 = arith.cmpi eq, %arg0, %c0_i32 : i32
    %1 = arith.extui %0 : i1 to i32
    %c0_i32_0 = arith.constant 0 : i32
    %2 = arith.cmpi ne, %1, %c0_i32_0 : i32
    scf.if %2 {
      %cst_76 = arith.constant 0.000000e+00 : f32
      %161 = vector.broadcast %cst_76 : f32 to vector<16x256xf32>
      %c0_77 = arith.constant 0 : index
      %c0_78 = arith.constant 0 : index
      %162 = vector.load %arg5[%c0_77, %c0_78] : memref<16x256xf32, #tpu.memory_space<vmem>>, vector<16x256xf32>
      tpu.vector_store %arg5[%c0_77, %c0_78], %161 {strides = array<i32>} : memref<16x256xf32, #tpu.memory_space<vmem>>, vector<16x256xf32>,
    } else {
    }
    %c256_i32 = arith.constant 256 : i32
    %3 = arith.muli %arg0, %c256_i32 : i32
    %4 = tpu.iota {dimensions = array<i32: 1>} : vector<1x256xi32>
    %5 = vector.broadcast %3 : i32 to vector<1x256xi32>
    %6 = arith.addi %5, %4 : vector<1x256xi32>
    %c0 = arith.constant 0 : index
    %c0_1 = arith.constant 0 : index
    %7 = vector.load %arg3[%c0, %c0_1] : memref<40x256xf32, #tpu.memory_space<vmem>>, vector<1x256xf32>
    %c0_2 = arith.constant 0 : index
    %c0_3 = arith.constant 0 : index
    %8 = vector.load %arg5[%c0_2, %c0_3] : memref<16x256xf32, #tpu.memory_space<vmem>>, vector<1x256xf32>
    %9 = arith.addf %8, %7 : vector<1x256xf32>
    %c0_4 = arith.constant 0 : index
    %c0_5 = arith.constant 0 : index
    %10 = vector.load %arg5[%c0_4, %c0_5] : memref<16x256xf32, #tpu.memory_space<vmem>>, vector<1x256xf32>
    tpu.vector_store %arg5[%c0_4, %c0_5], %9 {strides = array<i32>} : memref<16x256xf32, #tpu.memory_space<vmem>>, vector<1x256xf32>,
    %c1 = arith.constant 1 : index
    %c0_6 = arith.constant 0 : index
    %11 = vector.load %arg3[%c1, %c0_6] : memref<40x256xf32, #tpu.memory_space<vmem>>, vector<3x256xf32>
    %12 = arith.mulf %11, %11 : vector<3x256xf32>
    %cst = arith.constant dense<0.000000e+00> : vector<256xf32>
    %13 = vector.multi_reduction <add>, %12, %cst [0] : vector<3x256xf32> to vector<256xf32>
    %14 = vector.shape_cast %13 : vector<256xf32> to vector<1x256xf32>
    %15 = math.sqrt %14 : vector<1x256xf32>
    %c1_7 = arith.constant 1 : index
    %c0_8 = arith.constant 0 : index
    %16 = vector.load %arg5[%c1_7, %c0_8] : memref<16x256xf32, #tpu.memory_space<vmem>>, vector<1x256xf32>
    %17 = arith.addf %16, %15 : vector<1x256xf32>
    %c1_9 = arith.constant 1 : index
    %c0_10 = arith.constant 0 : index
    %18 = vector.load %arg5[%c1_9, %c0_10] : memref<16x256xf32, #tpu.memory_space<vmem>>, vector<1x256xf32>
    tpu.vector_store %arg5[%c1_9, %c0_10], %17 {strides = array<i32>} : memref<16x256xf32, #tpu.memory_space<vmem>>, vector<1x256xf32>,
    %c4 = arith.constant 4 : index
    %c0_11 = arith.constant 0 : index
    %19 = vector.load %arg3[%c4, %c0_11] : memref<40x256xf32, #tpu.memory_space<vmem>>, vector<3x256xf32>
    %20 = arith.mulf %19, %19 : vector<3x256xf32>
    %cst_12 = arith.constant dense<0.000000e+00> : vector<256xf32>
    %21 = vector.multi_reduction <add>, %20, %cst_12 [0] : vector<3x256xf32> to vector<256xf32>
    %22 = vector.shape_cast %21 : vector<256xf32> to vector<1x256xf32>
    %23 = math.sqrt %22 : vector<1x256xf32>
    %c2 = arith.constant 2 : index
    %c0_13 = arith.constant 0 : index
    %24 = vector.load %arg5[%c2, %c0_13] : memref<16x256xf32, #tpu.memory_space<vmem>>, vector<1x256xf32>
    %25 = arith.addf %24, %23 : vector<1x256xf32>
    %c2_14 = arith.constant 2 : index
    %c0_15 = arith.constant 0 : index
    %26 = vector.load %arg5[%c2_14, %c0_15] : memref<16x256xf32, #tpu.memory_space<vmem>>, vector<1x256xf32>
    tpu.vector_store %arg5[%c2_14, %c0_15], %25 {strides = array<i32>} : memref<16x256xf32, #tpu.memory_space<vmem>>, vector<1x256xf32>,
    %c7 = arith.constant 7 : index
    %c0_16 = arith.constant 0 : index
    %27 = vector.load %arg3[%c7, %c0_16] : memref<40x256xf32, #tpu.memory_space<vmem>>, vector<3x256xf32>
    %28 = arith.mulf %27, %27 : vector<3x256xf32>
    %cst_17 = arith.constant dense<0.000000e+00> : vector<256xf32>
    %29 = vector.multi_reduction <add>, %28, %cst_17 [0] : vector<3x256xf32> to vector<256xf32>
    %30 = vector.shape_cast %29 : vector<256xf32> to vector<1x256xf32>
    %31 = math.sqrt %30 : vector<1x256xf32>
    %c3 = arith.constant 3 : index
    %32 = memref.load %arg1[%c3] : memref<9xi32, #tpu.memory_space<smem>>
    %33 = vector.broadcast %32 : i32 to vector<1x256xi32>
    %34 = arith.cmpi slt, %6, %33 : vector<1x256xi32>
    %35 = arith.extui %34 : vector<1x256xi1> to vector<1x256xi32>
    %36 = arith.sitofp %35 : vector<1x256xi32> to vector<1x256xf32>
    %cst_18 = arith.constant 1.000000e+00 : f32
    %37 = vector.broadcast %cst_18 : f32 to vector<1x256xf32>
    %38 = arith.subf %31, %37 : vector<1x256xf32>
    %cst_19 = arith.constant 1.000000e+00 : f32
    %39 = vector.broadcast %cst_19 : f32 to vector<1x256xf32>
    %40 = arith.subf %31, %39 : vector<1x256xf32>
    %41 = arith.mulf %38, %40 : vector<1x256xf32>
    %42 = arith.mulf %41, %36 : vector<1x256xf32>
    %c3_20 = arith.constant 3 : index
    %c0_21 = arith.constant 0 : index
    %43 = vector.load %arg5[%c3_20, %c0_21] : memref<16x256xf32, #tpu.memory_space<vmem>>, vector<1x256xf32>
    %44 = arith.addf %43, %42 : vector<1x256xf32>
    %c3_22 = arith.constant 3 : index
    %c0_23 = arith.constant 0 : index
    %45 = vector.load %arg5[%c3_22, %c0_23] : memref<16x256xf32, #tpu.memory_space<vmem>>, vector<1x256xf32>
    tpu.vector_store %arg5[%c3_22, %c0_23], %44 {strides = array<i32>} : memref<16x256xf32, #tpu.memory_space<vmem>>, vector<1x256xf32>,
    %c36 = arith.constant 36 : index
    %c0_24 = arith.constant 0 : index
    %46 = vector.load %arg3[%c36, %c0_24] : memref<40x256xf32, #tpu.memory_space<vmem>>, vector<3x256xf32>
    %47 = arith.mulf %46, %46 : vector<3x256xf32>
    %cst_25 = arith.constant dense<0.000000e+00> : vector<256xf32>
    %48 = vector.multi_reduction <add>, %47, %cst_25 [0] : vector<3x256xf32> to vector<256xf32>
    %49 = vector.shape_cast %48 : vector<256xf32> to vector<1x256xf32>
    %50 = math.sqrt %49 : vector<1x256xf32>
    %c4_26 = arith.constant 4 : index
    %51 = memref.load %arg1[%c4_26] : memref<9xi32, #tpu.memory_space<smem>>
    %52 = vector.broadcast %51 : i32 to vector<1x256xi32>
    %53 = arith.cmpi slt, %6, %52 : vector<1x256xi32>
    %54 = arith.extui %53 : vector<1x256xi1> to vector<1x256xi32>
    %55 = arith.sitofp %54 : vector<1x256xi32> to vector<1x256xf32>
    %cst_27 = arith.constant 1.000000e+00 : f32
    %56 = vector.broadcast %cst_27 : f32 to vector<1x256xf32>
    %57 = arith.subf %50, %56 : vector<1x256xf32>
    %cst_28 = arith.constant 1.000000e+00 : f32
    %58 = vector.broadcast %cst_28 : f32 to vector<1x256xf32>
    %59 = arith.subf %50, %58 : vector<1x256xf32>
    %60 = arith.mulf %57, %59 : vector<1x256xf32>
    %61 = arith.mulf %60, %55 : vector<1x256xf32>
    %c4_29 = arith.constant 4 : index
    %c0_30 = arith.constant 0 : index
    %62 = vector.load %arg5[%c4_29, %c0_30] : memref<16x256xf32, #tpu.memory_space<vmem>>, vector<1x256xf32>
    %63 = arith.addf %62, %61 : vector<1x256xf32>
    %c4_31 = arith.constant 4 : index
    %c0_32 = arith.constant 0 : index
    %64 = vector.load %arg5[%c4_31, %c0_32] : memref<16x256xf32, #tpu.memory_space<vmem>>, vector<1x256xf32>
    tpu.vector_store %arg5[%c4_31, %c0_32], %63 {strides = array<i32>} : memref<16x256xf32, #tpu.memory_space<vmem>>, vector<1x256xf32>,
    %c10 = arith.constant 10 : index
    %c0_33 = arith.constant 0 : index
    %65 = vector.load %arg3[%c10, %c0_33] : memref<40x256xf32, #tpu.memory_space<vmem>>, vector<3x256xf32>
    %c13 = arith.constant 13 : index
    %c0_34 = arith.constant 0 : index
    %66 = vector.load %arg3[%c13, %c0_34] : memref<40x256xf32, #tpu.memory_space<vmem>>, vector<3x256xf32>
    %c16 = arith.constant 16 : index
    %c0_35 = arith.constant 0 : index
    %67 = vector.load %arg3[%c16, %c0_35] : memref<40x256xf32, #tpu.memory_space<vmem>>, vector<3x256xf32>
    %68 = arith.mulf %65, %65 : vector<3x256xf32>
    %cst_36 = arith.constant dense<0.000000e+00> : vector<256xf32>
    %69 = vector.multi_reduction <add>, %68, %cst_36 [0] : vector<3x256xf32> to vector<256xf32>
    %70 = vector.shape_cast %69 : vector<256xf32> to vector<1x256xf32>
    %cst_37 = arith.constant 9.99999993E-9 : f32
    %71 = vector.broadcast %cst_37 : f32 to vector<1x256xf32>
    %72 = arith.addf %70, %71 : vector<1x256xf32>
    %73 = math.rsqrt %72 : vector<1x256xf32>
    %74 = vector.broadcast %73 : vector<1x256xf32> to vector<3x256xf32>
    %75 = arith.mulf %65, %74 : vector<3x256xf32>
    %76 = arith.mulf %66, %66 : vector<3x256xf32>
    %cst_38 = arith.constant dense<0.000000e+00> : vector<256xf32>
    %77 = vector.multi_reduction <add>, %76, %cst_38 [0] : vector<3x256xf32> to vector<256xf32>
    %78 = vector.shape_cast %77 : vector<256xf32> to vector<1x256xf32>
    %cst_39 = arith.constant 9.99999993E-9 : f32
    %79 = vector.broadcast %cst_39 : f32 to vector<1x256xf32>
    %80 = arith.addf %78, %79 : vector<1x256xf32>
    %81 = math.rsqrt %80 : vector<1x256xf32>
    %82 = vector.broadcast %81 : vector<1x256xf32> to vector<3x256xf32>
    %83 = arith.mulf %66, %82 : vector<3x256xf32>
    %cst_40 = arith.constant 0.000000e+00 : f32
    %84 = vector.broadcast %cst_40 : f32 to vector<3x256xf32>
    %85 = arith.subf %84, %67 : vector<3x256xf32>
    %86 = arith.mulf %75, %85 : vector<3x256xf32>
    %cst_41 = arith.constant dense<0.000000e+00> : vector<256xf32>
    %87 = vector.multi_reduction <add>, %86, %cst_41 [0] : vector<3x256xf32> to vector<256xf32>
    %88 = vector.shape_cast %87 : vector<256xf32> to vector<1x256xf32>
    %cst_42 = arith.constant 0.000000e+00 : f32
    %cst_43 = arith.constant 1.000000e+00 : f32
    %89 = vector.broadcast %cst_42 : f32 to vector<1x256xf32>
    %90 = arith.maximumf %89, %88 : vector<1x256xf32>
    %91 = vector.broadcast %cst_43 : f32 to vector<1x256xf32>
    %92 = arith.minimumf %91, %90 : vector<1x256xf32>
    %93 = arith.subf %75, %83 : vector<3x256xf32>
    %94 = math.absf %93 : vector<3x256xf32>
    %cst_44 = arith.constant dense<0.000000e+00> : vector<256xf32>
    %95 = vector.multi_reduction <add>, %94, %cst_44 [0] : vector<3x256xf32> to vector<256xf32>
    %96 = vector.shape_cast %95 : vector<256xf32> to vector<1x256xf32>
    %97 = arith.mulf %75, %83 : vector<3x256xf32>
    %cst_45 = arith.constant dense<0.000000e+00> : vector<256xf32>
    %98 = vector.multi_reduction <add>, %97, %cst_45 [0] : vector<3x256xf32> to vector<256xf32>
    %99 = vector.shape_cast %98 : vector<256xf32> to vector<1x256xf32>
    %cst_46 = arith.constant 1.000000e+00 : f32
    %100 = vector.broadcast %cst_46 : f32 to vector<1x256xf32>
    %101 = arith.subf %100, %99 : vector<1x256xf32>
    %102 = arith.addf %96, %101 : vector<1x256xf32>
    %103 = arith.mulf %102, %92 : vector<1x256xf32>
    %c5 = arith.constant 5 : index
    %c0_47 = arith.constant 0 : index
    %104 = vector.load %arg5[%c5, %c0_47] : memref<16x256xf32, #tpu.memory_space<vmem>>, vector<1x256xf32>
    %105 = arith.addf %104, %103 : vector<1x256xf32>
    %c5_48 = arith.constant 5 : index
    %c0_49 = arith.constant 0 : index
    %106 = vector.load %arg5[%c5_48, %c0_49] : memref<16x256xf32, #tpu.memory_space<vmem>>, vector<1x256xf32>
    tpu.vector_store %arg5[%c5_48, %c0_49], %105 {strides = array<i32>} : memref<16x256xf32, #tpu.memory_space<vmem>>, vector<1x256xf32>,
    %c19 = arith.constant 19 : index
    %c0_50 = arith.constant 0 : index
    %107 = vector.load %arg3[%c19, %c0_50] : memref<40x256xf32, #tpu.memory_space<vmem>>, vector<8x256xf32>
    %c27 = arith.constant 27 : index
    %c0_51 = arith.constant 0 : index
    %108 = vector.load %arg3[%c27, %c0_51] : memref<40x256xf32, #tpu.memory_space<vmem>>, vector<1x256xf32>
    %109 = arith.fptosi %108 : vector<1x256xf32> to vector<1x256xi32>
    %cst_52 = arith.constant dense<0xFF800000> : vector<256xf32>
    %110 = vector.multi_reduction <maximumf>, %107, %cst_52 [0] : vector<8x256xf32> to vector<256xf32>
    %111 = vector.shape_cast %110 : vector<256xf32> to vector<1x256xf32>
    %112 = vector.broadcast %111 : vector<1x256xf32> to vector<8x256xf32>
    %113 = arith.subf %107, %112 : vector<8x256xf32>
    %114 = math.exp %113 : vector<8x256xf32>
    %cst_53 = arith.constant dense<0.000000e+00> : vector<256xf32>
    %115 = vector.multi_reduction <add>, %114, %cst_53 [0] : vector<8x256xf32> to vector<256xf32>
    %116 = vector.shape_cast %115 : vector<256xf32> to vector<1x256xf32>
    %117 = math.log %116 : vector<1x256xf32>
    %118 = arith.addf %117, %111 : vector<1x256xf32>
    %119 = tpu.iota {dimensions = array<i32: 0>} : vector<8x256xi32>
    %120 = vector.broadcast %109 : vector<1x256xi32> to vector<8x256xi32>
    %121 = arith.cmpi eq, %119, %120 : vector<8x256xi32>
    %122 = arith.extui %121 : vector<8x256xi1> to vector<8x256xi32>
    %123 = arith.sitofp %122 : vector<8x256xi32> to vector<8x256xf32>
    %124 = arith.mulf %123, %107 : vector<8x256xf32>
    %cst_54 = arith.constant dense<0.000000e+00> : vector<256xf32>
    %125 = vector.multi_reduction <add>, %124, %cst_54 [0] : vector<8x256xf32> to vector<256xf32>
    %126 = vector.shape_cast %125 : vector<256xf32> to vector<1x256xf32>
    %c6 = arith.constant 6 : index
    %127 = memref.load %arg1[%c6] : memref<9xi32, #tpu.memory_space<smem>>
    %128 = vector.broadcast %127 : i32 to vector<1x256xi32>
    %129 = arith.cmpi slt, %6, %128 : vector<1x256xi32>
    %130 = arith.extui %129 : vector<1x256xi1> to vector<1x256xi32>
    %131 = arith.sitofp %130 : vector<1x256xi32> to vector<1x256xf32>
    %132 = arith.subf %118, %126 : vector<1x256xf32>
    %133 = arith.mulf %132, %131 : vector<1x256xf32>
    %c6_55 = arith.constant 6 : index
    %c0_56 = arith.constant 0 : index
    %134 = vector.load %arg5[%c6_55, %c0_56] : memref<16x256xf32, #tpu.memory_space<vmem>>, vector<1x256xf32>
    %135 = arith.addf %134, %133 : vector<1x256xf32>
    %c6_57 = arith.constant 6 : index
    %c0_58 = arith.constant 0 : index
    %136 = vector.load %arg5[%c6_57, %c0_58] : memref<16x256xf32, #tpu.memory_space<vmem>>, vector<1x256xf32>
    tpu.vector_store %arg5[%c6_57, %c0_58], %135 {strides = array<i32>} : memref<16x256xf32, #tpu.memory_space<vmem>>, vector<1x256xf32>,
    %c28 = arith.constant 28 : index
    %c0_59 = arith.constant 0 : index
    %137 = vector.load %arg3[%c28, %c0_59] : memref<40x256xf32, #tpu.memory_space<vmem>>, vector<1x256xf32>
    %c29 = arith.constant 29 : index
    %c0_60 = arith.constant 0 : index
    %138 = vector.load %arg3[%c29, %c0_60] : memref<40x256xf32, #tpu.memory_space<vmem>>, vector<1x256xf32>
    %139 = arith.mulf %137, %138 : vector<1x256xf32>
    %c7_61 = arith.constant 7 : index
    %c0_62 = arith.constant 0 : index
    %140 = vector.load %arg5[%c7_61, %c0_62] : memref<16x256xf32, #tpu.memory_space<vmem>>, vector<1x256xf32>
    %141 = arith.addf %140, %139 : vector<1x256xf32>
    %c7_63 = arith.constant 7 : index
    %c0_64 = arith.constant 0 : index
    %142 = vector.load %arg5[%c7_63, %c0_64] : memref<16x256xf32, #tpu.memory_space<vmem>>, vector<1x256xf32>
    tpu.vector_store %arg5[%c7_63, %c0_64], %141 {strides = array<i32>} : memref<16x256xf32, #tpu.memory_space<vmem>>, vector<1x256xf32>,
    %143 = arith.addf %137, %138 : vector<1x256xf32>
    %144 = arith.mulf %137, %138 : vector<1x256xf32>
    %145 = arith.subf %143, %144 : vector<1x256xf32>
    %c8 = arith.constant 8 : index
    %c0_65 = arith.constant 0 : index
    %146 = vector.load %arg5[%c8, %c0_65] : memref<16x256xf32, #tpu.memory_space<vmem>>, vector<1x256xf32>
    %147 = arith.addf %146, %145 : vector<1x256xf32>
    %c8_66 = arith.constant 8 : index
    %c0_67 = arith.constant 0 : index
    %148 = vector.load %arg5[%c8_66, %c0_67] : memref<16x256xf32, #tpu.memory_space<vmem>>, vector<1x256xf32>
    tpu.vector_store %arg5[%c8_66, %c0_67], %147 {strides = array<i32>} : memref<16x256xf32, #tpu.memory_space<vmem>>, vector<1x256xf32>,
    %c30 = arith.constant 30 : index
    %c0_68 = arith.constant 0 : index
    %149 = vector.load %arg3[%c30, %c0_68] : memref<40x256xf32, #tpu.memory_space<vmem>>, vector<3x256xf32>
    %c33 = arith.constant 33 : index
    %c0_69 = arith.constant 0 : index
    %150 = vector.load %arg3[%c33, %c0_69] : memref<40x256xf32, #tpu.memory_space<vmem>>, vector<3x256xf32>
    %151 = arith.subf %149, %150 : vector<3x256xf32>
    %152 = arith.mulf %151, %151 : vector<3x256xf32>
    %cst_70 = arith.constant dense<0.000000e+00> : vector<256xf32>
    %153 = vector.multi_reduction <add>, %152, %cst_70 [0] : vector<3x256xf32> to vector<256xf32>
    %154 = vector.shape_cast %153 : vector<256xf32> to vector<1x256xf32>
    %c9 = arith.constant 9 : index
    %c0_71 = arith.constant 0 : index
    %155 = vector.load %arg5[%c9, %c0_71] : memref<16x256xf32, #tpu.memory_space<vmem>>, vector<1x256xf32>
    %156 = arith.addf %155, %154 : vector<1x256xf32>
    %c9_72 = arith.constant 9 : index
    %c0_73 = arith.constant 0 : index
    %157 = vector.load %arg5[%c9_72, %c0_73] : memref<16x256xf32, #tpu.memory_space<vmem>>, vector<1x256xf32>
    tpu.vector_store %arg5[%c9_72, %c0_73], %156 {strides = array<i32>} : memref<16x256xf32, #tpu.memory_space<vmem>>, vector<1x256xf32>,
    %c0_i32_74 = arith.constant 0 : i32
    %158 = arith.cmpi eq, %arg0, %c0_i32_74 : i32
    %159 = arith.extui %158 : i1 to i32
    %c0_i32_75 = arith.constant 0 : i32
    %160 = arith.cmpi ne, %159, %c0_i32_75 : i32
    scf.if %160 {
      %c0_76 = arith.constant 0 : index
      %c0_77 = arith.constant 0 : index
      %161 = vector.load %arg5[%c0_76, %c0_77] : memref<16x256xf32, #tpu.memory_space<vmem>>, vector<1x256xf32>
      %162 = vector.shape_cast %161 : vector<1x256xf32> to vector<1x1x256xf32>
      %cst_78 = arith.constant dense<0.000000e+00> : vector<1xf32>
      %163 = vector.multi_reduction <add>, %162, %cst_78 [1, 2] : vector<1x1x256xf32> to vector<1xf32>
      %164 = vector.shape_cast %163 : vector<1xf32> to vector<1x1x1xf32>
      %165 = vector.extract %164[0, 0, 0] : f32 from vector<1x1x1xf32>
      %c0_79 = arith.constant 0 : index
      %166 = memref.load %arg1[%c0_79] : memref<9xi32, #tpu.memory_space<smem>>
      %c1_i32 = arith.constant 1 : i32
      %167 = arith.maxsi %166, %c1_i32 : i32
      %168 = arith.sitofp %167 : i32 to f32
      %169 = arith.divf %165, %168 : f32
      %c1_80 = arith.constant 1 : index
      %c0_81 = arith.constant 0 : index
      %170 = vector.load %arg5[%c1_80, %c0_81] : memref<16x256xf32, #tpu.memory_space<vmem>>, vector<1x256xf32>
      %171 = vector.shape_cast %170 : vector<1x256xf32> to vector<1x1x256xf32>
      %cst_82 = arith.constant dense<0.000000e+00> : vector<1xf32>
      %172 = vector.multi_reduction <add>, %171, %cst_82 [1, 2] : vector<1x1x256xf32> to vector<1xf32>
      %173 = vector.shape_cast %172 : vector<1xf32> to vector<1x1x1xf32>
      %174 = vector.extract %173[0, 0, 0] : f32 from vector<1x1x1xf32>
      %c1_83 = arith.constant 1 : index
      %175 = memref.load %arg1[%c1_83] : memref<9xi32, #tpu.memory_space<smem>>
      %c1_i32_84 = arith.constant 1 : i32
      %176 = arith.maxsi %175, %c1_i32_84 : i32
      %177 = arith.sitofp %176 : i32 to f32
      %178 = arith.divf %174, %177 : f32
      %c2_85 = arith.constant 2 : index
      %c0_86 = arith.constant 0 : index
      %179 = vector.load %arg5[%c2_85, %c0_86] : memref<16x256xf32, #tpu.memory_space<vmem>>, vector<1x256xf32>
      %180 = vector.shape_cast %179 : vector<1x256xf32> to vector<1x1x256xf32>
      %cst_87 = arith.constant dense<0.000000e+00> : vector<1xf32>
      %181 = vector.multi_reduction <add>, %180, %cst_87 [1, 2] : vector<1x1x256xf32> to vector<1xf32>
      %182 = vector.shape_cast %181 : vector<1xf32> to vector<1x1x1xf32>
      %183 = vector.extract %182[0, 0, 0] : f32 from vector<1x1x1xf32>
      %c2_88 = arith.constant 2 : index
      %184 = memref.load %arg1[%c2_88] : memref<9xi32, #tpu.memory_space<smem>>
      %c1_i32_89 = arith.constant 1 : i32
      %185 = arith.maxsi %184, %c1_i32_89 : i32
      %186 = arith.sitofp %185 : i32 to f32
      %187 = arith.divf %183, %186 : f32
      %c3_90 = arith.constant 3 : index
      %c0_91 = arith.constant 0 : index
      %188 = vector.load %arg5[%c3_90, %c0_91] : memref<16x256xf32, #tpu.memory_space<vmem>>, vector<1x256xf32>
      %189 = vector.shape_cast %188 : vector<1x256xf32> to vector<1x1x256xf32>
      %cst_92 = arith.constant dense<0.000000e+00> : vector<1xf32>
      %190 = vector.multi_reduction <add>, %189, %cst_92 [1, 2] : vector<1x1x256xf32> to vector<1xf32>
      %191 = vector.shape_cast %190 : vector<1xf32> to vector<1x1x1xf32>
      %192 = vector.extract %191[0, 0, 0] : f32 from vector<1x1x1xf32>
      %c3_93 = arith.constant 3 : index
      %193 = memref.load %arg1[%c3_93] : memref<9xi32, #tpu.memory_space<smem>>
      %c1_i32_94 = arith.constant 1 : i32
      %194 = arith.maxsi %193, %c1_i32_94 : i32
      %195 = arith.sitofp %194 : i32 to f32
      %196 = arith.divf %192, %195 : f32
      %c4_95 = arith.constant 4 : index
      %c0_96 = arith.constant 0 : index
      %197 = vector.load %arg5[%c4_95, %c0_96] : memref<16x256xf32, #tpu.memory_space<vmem>>, vector<1x256xf32>
      %198 = vector.shape_cast %197 : vector<1x256xf32> to vector<1x1x256xf32>
      %cst_97 = arith.constant dense<0.000000e+00> : vector<1xf32>
      %199 = vector.multi_reduction <add>, %198, %cst_97 [1, 2] : vector<1x1x256xf32> to vector<1xf32>
      %200 = vector.shape_cast %199 : vector<1xf32> to vector<1x1x1xf32>
      %201 = vector.extract %200[0, 0, 0] : f32 from vector<1x1x1xf32>
      %c4_98 = arith.constant 4 : index
      %202 = memref.load %arg1[%c4_98] : memref<9xi32, #tpu.memory_space<smem>>
      %c1_i32_99 = arith.constant 1 : i32
      %203 = arith.maxsi %202, %c1_i32_99 : i32
      %204 = arith.sitofp %203 : i32 to f32
      %205 = arith.divf %201, %204 : f32
      %c5_100 = arith.constant 5 : index
      %c0_101 = arith.constant 0 : index
      %206 = vector.load %arg5[%c5_100, %c0_101] : memref<16x256xf32, #tpu.memory_space<vmem>>, vector<1x256xf32>
      %207 = vector.shape_cast %206 : vector<1x256xf32> to vector<1x1x256xf32>
      %cst_102 = arith.constant dense<0.000000e+00> : vector<1xf32>
      %208 = vector.multi_reduction <add>, %207, %cst_102 [1, 2] : vector<1x1x256xf32> to vector<1xf32>
      %209 = vector.shape_cast %208 : vector<1xf32> to vector<1x1x1xf32>
      %210 = vector.extract %209[0, 0, 0] : f32 from vector<1x1x1xf32>
      %c5_103 = arith.constant 5 : index
      %211 = memref.load %arg1[%c5_103] : memref<9xi32, #tpu.memory_space<smem>>
      %c1_i32_104 = arith.constant 1 : i32
      %212 = arith.maxsi %211, %c1_i32_104 : i32
      %213 = arith.sitofp %212 : i32 to f32
      %214 = arith.divf %210, %213 : f32
      %c6_105 = arith.constant 6 : index
      %c0_106 = arith.constant 0 : index
      %215 = vector.load %arg5[%c6_105, %c0_106] : memref<16x256xf32, #tpu.memory_space<vmem>>, vector<1x256xf32>
      %216 = vector.shape_cast %215 : vector<1x256xf32> to vector<1x1x256xf32>
      %cst_107 = arith.constant dense<0.000000e+00> : vector<1xf32>
      %217 = vector.multi_reduction <add>, %216, %cst_107 [1, 2] : vector<1x1x256xf32> to vector<1xf32>
      %218 = vector.shape_cast %217 : vector<1xf32> to vector<1x1x1xf32>
      %219 = vector.extract %218[0, 0, 0] : f32 from vector<1x1x1xf32>
      %c6_108 = arith.constant 6 : index
      %220 = memref.load %arg1[%c6_108] : memref<9xi32, #tpu.memory_space<smem>>
      %c1_i32_109 = arith.constant 1 : i32
      %221 = arith.maxsi %220, %c1_i32_109 : i32
      %222 = arith.sitofp %221 : i32 to f32
      %223 = arith.divf %219, %222 : f32
      %c7_110 = arith.constant 7 : index
      %c0_111 = arith.constant 0 : index
      %224 = vector.load %arg5[%c7_110, %c0_111] : memref<16x256xf32, #tpu.memory_space<vmem>>, vector<1x256xf32>
      %225 = vector.shape_cast %224 : vector<1x256xf32> to vector<1x1x256xf32>
      %cst_112 = arith.constant dense<0.000000e+00> : vector<1xf32>
      %226 = vector.multi_reduction <add>, %225, %cst_112 [1, 2] : vector<1x1x256xf32> to vector<1xf32>
      %227 = vector.shape_cast %226 : vector<1xf32> to vector<1x1x1xf32>
      %228 = vector.extract %227[0, 0, 0] : f32 from vector<1x1x1xf32>
      %c8_113 = arith.constant 8 : index
      %c0_114 = arith.constant 0 : index
      %229 = vector.load %arg5[%c8_113, %c0_114] : memref<16x256xf32, #tpu.memory_space<vmem>>, vector<1x256xf32>
      %230 = vector.shape_cast %229 : vector<1x256xf32> to vector<1x1x256xf32>
      %cst_115 = arith.constant dense<0.000000e+00> : vector<1xf32>
      %231 = vector.multi_reduction <add>, %230, %cst_115 [1, 2] : vector<1x1x256xf32> to vector<1xf32>
      %232 = vector.shape_cast %231 : vector<1xf32> to vector<1x1x1xf32>
      %233 = vector.extract %232[0, 0, 0] : f32 from vector<1x1x1xf32>
      %cst_116 = arith.constant 9.99999993E-9 : f32
      %234 = arith.addf %233, %cst_116 : f32
      %235 = arith.divf %228, %234 : f32
      %cst_117 = arith.constant 1.000000e+00 : f32
      %236 = arith.subf %cst_117, %235 : f32
      %c9_118 = arith.constant 9 : index
      %c0_119 = arith.constant 0 : index
      %237 = vector.load %arg5[%c9_118, %c0_119] : memref<16x256xf32, #tpu.memory_space<vmem>>, vector<1x256xf32>
      %238 = vector.shape_cast %237 : vector<1x256xf32> to vector<1x1x256xf32>
      %cst_120 = arith.constant dense<0.000000e+00> : vector<1xf32>
      %239 = vector.multi_reduction <add>, %238, %cst_120 [1, 2] : vector<1x1x256xf32> to vector<1xf32>
      %240 = vector.shape_cast %239 : vector<1xf32> to vector<1x1x1xf32>
      %241 = vector.extract %240[0, 0, 0] : f32 from vector<1x1x1xf32>
      %c8_121 = arith.constant 8 : index
      %242 = memref.load %arg1[%c8_121] : memref<9xi32, #tpu.memory_space<smem>>
      %c1_i32_122 = arith.constant 1 : i32
      %243 = arith.maxsi %242, %c1_i32_122 : i32
      %244 = arith.sitofp %243 : i32 to f32
      %cst_123 = arith.constant 3.000000e+00 : f32
      %245 = arith.mulf %244, %cst_123 : f32
      %246 = arith.divf %241, %245 : f32
      %c0_124 = arith.constant 0 : index
      %247 = memref.load %arg4[%c0_124] : memref<10xf32, #tpu.memory_space<smem>>
      memref.store %169, %arg4[%c0_124] : memref<10xf32, #tpu.memory_space<smem>>
      %c0_125 = arith.constant 0 : index
      %248 = memref.load %arg2[%c0_125] : memref<9xf32, #tpu.memory_space<smem>>
      %249 = arith.mulf %248, %169 : f32
      %cst_126 = arith.constant 0.000000e+00 : f32
      %250 = arith.addf %cst_126, %249 : f32
      %c1_127 = arith.constant 1 : index
      %251 = memref.load %arg4[%c1_127] : memref<10xf32, #tpu.memory_space<smem>>
      memref.store %178, %arg4[%c1_127] : memref<10xf32, #tpu.memory_space<smem>>
      %c1_128 = arith.constant 1 : index
      %252 = memref.load %arg2[%c1_128] : memref<9xf32, #tpu.memory_space<smem>>
      %253 = arith.mulf %252, %178 : f32
      %254 = arith.addf %250, %253 : f32
      %c2_129 = arith.constant 2 : index
      %255 = memref.load %arg4[%c2_129] : memref<10xf32, #tpu.memory_space<smem>>
      memref.store %187, %arg4[%c2_129] : memref<10xf32, #tpu.memory_space<smem>>
      %c2_130 = arith.constant 2 : index
      %256 = memref.load %arg2[%c2_130] : memref<9xf32, #tpu.memory_space<smem>>
      %257 = arith.mulf %256, %187 : f32
      %258 = arith.addf %254, %257 : f32
      %c3_131 = arith.constant 3 : index
      %259 = memref.load %arg4[%c3_131] : memref<10xf32, #tpu.memory_space<smem>>
      memref.store %196, %arg4[%c3_131] : memref<10xf32, #tpu.memory_space<smem>>
      %c3_132 = arith.constant 3 : index
      %260 = memref.load %arg2[%c3_132] : memref<9xf32, #tpu.memory_space<smem>>
      %261 = arith.mulf %260, %196 : f32
      %262 = arith.addf %258, %261 : f32
      %c4_133 = arith.constant 4 : index
      %263 = memref.load %arg4[%c4_133] : memref<10xf32, #tpu.memory_space<smem>>
      memref.store %205, %arg4[%c4_133] : memref<10xf32, #tpu.memory_space<smem>>
      %c4_134 = arith.constant 4 : index
      %264 = memref.load %arg2[%c4_134] : memref<9xf32, #tpu.memory_space<smem>>
      %265 = arith.mulf %264, %205 : f32
      %266 = arith.addf %262, %265 : f32
      %c5_135 = arith.constant 5 : index
      %267 = memref.load %arg4[%c5_135] : memref<10xf32, #tpu.memory_space<smem>>
      memref.store %214, %arg4[%c5_135] : memref<10xf32, #tpu.memory_space<smem>>
      %c5_136 = arith.constant 5 : index
      %268 = memref.load %arg2[%c5_136] : memref<9xf32, #tpu.memory_space<smem>>
      %269 = arith.mulf %268, %214 : f32
      %270 = arith.addf %266, %269 : f32
      %c6_137 = arith.constant 6 : index
      %271 = memref.load %arg4[%c6_137] : memref<10xf32, #tpu.memory_space<smem>>
      memref.store %223, %arg4[%c6_137] : memref<10xf32, #tpu.memory_space<smem>>
      %c6_138 = arith.constant 6 : index
      %272 = memref.load %arg2[%c6_138] : memref<9xf32, #tpu.memory_space<smem>>
      %273 = arith.mulf %272, %223 : f32
      %274 = arith.addf %270, %273 : f32
      %c7_139 = arith.constant 7 : index
      %275 = memref.load %arg4[%c7_139] : memref<10xf32, #tpu.memory_space<smem>>
      memref.store %236, %arg4[%c7_139] : memref<10xf32, #tpu.memory_space<smem>>
      %c7_140 = arith.constant 7 : index
      %276 = memref.load %arg2[%c7_140] : memref<9xf32, #tpu.memory_space<smem>>
      %277 = arith.mulf %276, %236 : f32
      %278 = arith.addf %274, %277 : f32
      %c8_141 = arith.constant 8 : index
      %279 = memref.load %arg4[%c8_141] : memref<10xf32, #tpu.memory_space<smem>>
      memref.store %246, %arg4[%c8_141] : memref<10xf32, #tpu.memory_space<smem>>
      %c8_142 = arith.constant 8 : index
      %280 = memref.load %arg2[%c8_142] : memref<9xf32, #tpu.memory_space<smem>>
      %281 = arith.mulf %280, %246 : f32
      %282 = arith.addf %278, %281 : f32
      %c9_143 = arith.constant 9 : index
      %283 = memref.load %arg4[%c9_143] : memref<10xf32, #tpu.memory_space<smem>>
      memref.store %282, %arg4[%c9_143] : memref<10xf32, #tpu.memory_space<smem>>
    } else {
    }
    return
  }
  func.func @transform_0(%arg0: i32, %arg1: memref<9xi32, #tpu.memory_space<smem>>) -> i32 {
    %c0_i32 = arith.constant 0 : i32
    %c0_i32_0 = arith.constant 0 : i32
    return %c0_i32 : i32
  }
  func.func @transform_1(%arg0: i32, %arg1: memref<9xi32, #tpu.memory_space<smem>>) -> (i32, i32) {
    %c0_i32 = arith.constant 0 : i32
    %c0_i32_0 = arith.constant 0 : i32
    return %c0_i32, %arg0 : i32, i32
  }
  func.func @transform_2(%arg0: i32, %arg1: memref<9xi32, #tpu.memory_space<smem>>) -> i32 {
    %c0_i32 = arith.constant 0 : i32
    %c0_i32_0 = arith.constant 0 : i32
    return %c0_i32 : i32
  }
}

</mosaic_0001>

<bundles_post_ra>
// kernel: tpu_custom_call.1
= control target key start
LH: loop header
LB: loop body
LE: loop exit
PB: predicated region body
PF: predicated region fallthrough
CT: control target
= control target key end

     0   :  { %s1770_s0 = inlined_call_operand.hbm [shape: s32[9], index: 0, kind: input, shape index: {}]   ;;  %s1771_s1 = inlined_call_operand.vmem [shape: f32[9], index: 1, kind: input, shape index: {}]   ;;  %s1772_s2 = inlined_call_operand.hbm [shape: f32[40,256], index: 2, kind: input, shape index: {}]   ;;  %s1773_s3 = inlined_call_operand.hbm [shape: f32[10], index: 3, kind: output, shape index: {}]  }
   0x1   :  { %s1270_s14 = scalar_lea.hbm %s1770_s0, 16 }
   0x2   :  { %p1271_p0 = scmp.ne.s32.totalorder %s1770_s0, %s1270_s14  ;;  %p1274_p1 = scmp.lt.u32.totalorder %s1270_s14, %s1770_s0 }
   0x4   :  { %p1276_p2 = pnand %p1274_p1, %p1271_p0 }
   0x6   :  { %1279 = shalt.err (!%p1276_p2)  }
   0x7   :  { %s1332_s19 = smov [#allocation4]  }
   0x8   :  { %9 = dma.hbm_to_smem %s1770_s0, 16, %s1332_s19, [#allocation3] }
   0x9   :  { %1324 = dma.done.wait [#allocation3], 16 }
   0xa   :  { %1325 = vsyncadd [#allocation3], 4294967280 }
   0xb   :  { %11 = sfence }
   0xc   :  { %12 = vsyncpa [#allocation8], 0 }
   0xd   :  { %13 = vsyncpa [#allocation6], 0 }
   0xe   :  { %14 = vsyncpa [#allocation7], 0  ;;  %s21_s24 = sshll.u32 %s1771_s1, 4  ;;  %s22_s24 = int_to_ptr.vmem [resolvable:$true] %s21_s24 }
   0xf   :  { %s1280_s25 = scalar_lea.vmem %s22_s24, 16  ;;  %p1285_p4 = scmp.lt.s32.totalorder %s22_s24, %s22_s24 }
  0x10   :  { %p1281_p3 = scmp.ne.s32.totalorder %s22_s24, %s1280_s25  ;;  %p1286_p5 = scmp.lt.s32.totalorder %s1280_s25, %s1280_s25 }
  0x12   :  { %p1287_p6 = por %p1286_p5, %p1285_p4 }
  0x14   :  { %p1288_p7 = pnand %p1287_p6, %p1281_p3 }
  0x16   :  { %1291 = shalt.err (!%p1288_p7)
}
  0x17   :  { %s1333_s26 = smov [#allocation5]   ;;  %s1334_s0 = smov [#allocation9]  }
  0x18   :  { %24 = dma.vmem_to_smem %s22_s24, 16, %s1333_s26, [#allocation8]  }
  0x19   :  { %s30_s27 = sshll.u32 %s1334_s0, 4  ;;  %s1292_s30 = scalar_lea.hbm %s1772_s2, 1280  ;;  %s31_s27 = int_to_ptr.vmem [resolvable:$true] %s30_s27 }
  0x1a   :  { %p1293_p8 = scmp.ne.s32.totalorder %s1772_s2, %s1292_s30  ;;  %p1296_p9 = scmp.lt.u32.totalorder %s1292_s30, %s1772_s2 }
  0x1c   :  { %p1298_p10 = pnand %p1296_p9, %p1293_p8 }
  0x1e   :  { %1301 = shalt.err (!%p1298_p10)
}
  0x1f   :  { %s1302_s7 = scalar_lea.vmem %s31_s27, 1280  ;;  %p1307_p12 = scmp.lt.s32.totalorder %s31_s27, %s31_s27 }
  0x20   :  { %p1303_p11 = scmp.ne.s32.totalorder %s31_s27, %s1302_s7  ;;  %p1308_p13 = scmp.lt.s32.totalorder %s1302_s7, %s1302_s7 }
  0x22   :  { %p1309_p0 = por %p1308_p13, %p1307_p12 }
  0x24   :  { %p1310_p1 = pnand %p1309_p0, %p1303_p11 }
  0x26   :  { %1313 = shalt.err (!%p1310_p1)
}
  0x27   :  { %s1335_s8 = smov 256   ;;  %s1336_s9 = smov 16  }
  0x28   :  { %36 = dma.hbm_to_vmem [thread:$0]  %s1772_s2, 1280, %s31_s27, [#allocation6], %s1335_s8, %s1335_s8, %s1336_s9  }
  0x29   :  { %1326 = dma.done.wait [#allocation8], 16  }
  0x2a   :  { %1327 = vsyncadd [#allocation8], 4294967280 }
  0x2b   :  { %1328 = dma.done.wait [#allocation6], 1280  }
  0x2c   :  { %1329 = vsyncadd [#allocation6], 4294966016 }
  0x2d   :  { %43 = sfence }
  0x2e   :  { %v53_v0 = vlaneseq  ;;  %v1337_v1 = vmov 0.0   ;;  %v1338_v2 = vmov 1966171168   ;;  %v130_v4 = vld [vmem:[#allocation9] sm:$0x70]  ;;  %vm203_vm0 = vcmask 1040384  }
  0x2f   :  { %48 = vst [vmem:[#allocation2] sm:$0xff] %v1337_v1  ;;  %49 = vst [vmem:[#allocation2 + $0x8] sm:$0xff] %v1337_v1  ;;  %v1389_v3 = vunpack.c.l.s4 %v1338_v2  ;;  %v131_v5 = vld [vmem:[#allocation9 + $0x8] sm:$0x70]  ;;  %v132_v6 = vmul.f32 %v130_v4, %v130_v4  ;;  %v68_v8 = vld [vmem:[#allocation9] sm:$0xe] }
  0x30   :  { %50 = vst [vmem:[#allocation2 + $0x10] sm:$0xff] %v1337_v1  ;;  %51 = vst [vmem:[#allocation2 + $0x18] sm:$0xff] %v1337_v1  ;;  %v133_v7 = vmul.f32 %v131_v5, %v131_v5  ;;  %v69_v9 = vld [vmem:[#allocation9 + $0x8] sm:$0xe]  ;;  %vm1393_vm1 = vcmp.lt.s32.totalorder %v53_v0, 256  ;;  %vm78_vm2 = vcmask 1042432   ;;  %v70_v11 = vmul.f32 %v68_v8, %v68_v8 }
  0x31   :  { %v71_v12 = vmul.f32 %v69_v9, %v69_v9  ;;  %v191_v13 = vld [vmem:[#allocation9] sm:$0x80]  ;;  %v192_v14 = vld [vmem:[#allocation9 + $0x8] sm:$0x80]  ;;  %v1397_v16 = vshrl.u32 %v53_v0, 7  ;;  %v136_v17 = vrot.slane %v132_v6, 4  ;;  %v114_v20 = vunpack.c.0.s8 %v1389_v3 }
  0x32   :  { %v59_v15 = vld [vmem:[#allocation9] ss:$8 sm:$0x3]  ;;  %v137_v18 = vrot.slane %v133_v7, 4  ;;  %v1399_v19 = vand.u32 127, %v53_v0  ;;  %v74_v21 = vrot.slane %v70_v11, 1  ;;  %v195_v27 = vmul.f32 %v191_v13, %v191_v13 }
  0x33   :  { %v75_v22 = vrot.slane %v71_v12, 1  ;;  %v193_v23 = vld [vmem:[#allocation9 + $0x10] sm:$0x3]  ;;  %v194_v24 = vld [vmem:[#allocation9 + $0x18] sm:$0x3]  ;;  %v140_v25 = vsel %vm78_vm2, %v136_v17, 0.0  ;;  %v196_v28 = vmul.f32 %v192_v14, %v192_v14 }
  0x34   :  { %v147_v26 = vsel %vm78_vm2, %v137_v18, 0.0  ;;  %s1404_s2 = sld [smem:[#allocation4 + $0x3]]  ;;  %v141_v29 = vrot.slane %v140_v25, 4  ;;  %v79_v31 = vsel %vm78_vm2, %v74_v21, 0.0  ;;  %v1409_v34 = vsub.s32 0, %v1397_v16  ;;  %s1438_s12 = sld [smem:[#allocation4 + $0x4]] }
  0x35   :  { %v148_v30 = vrot.slane %v147_v26, 4  ;;  %v86_v32 = vsel %vm78_vm2, %v75_v22, 0.0  ;;  %v1412_v35 = vadd.s32 128, %v1399_v19  ;;  %v197_v36 = vmul.f32 %v193_v23, %v193_v23  ;;  %v277_v42 = vld [vmem:[#allocation9 + $0x40] sm:$0x70]  ;;  %s1708_s13 = sld [smem:[#allocation4 + $0x6]] }
  0x36   :  { %v60_v33 = vld [vmem:[#allocation2] ss:$8 sm:$0x3]  ;;  %v198_v37 = vmul.f32 %v194_v24, %v194_v24  ;;  %v142_v39 = vadd.f32 %v141_v29, %v140_v25  ;;  %v80_v41 = vrot.slane %v79_v31, 4  ;;  %v278_v43 = vld [vmem:[#allocation9 + $0x48] sm:$0x70]  ;;  %v279_v54 = vmul.f32 %v277_v42, %v277_v42 }
  0x37   :  { %v61_v38 = vadd.f32 %v60_v33, %v59_v15  ;;  %v149_v40 = vadd.f32 %v148_v30, %v147_v26  ;;  %v87_v44 = vrot.slane %v86_v32, 4  ;;  %v204_v45 = vrot.slane %v195_v27, 7  ;;  %s789_s14 = sld [smem:[#allocation4]]  ;;  %s1153_s16 = sld [smem:[#allocation4 + $0x1]] }
  0x38   :  { %v205_v46 = vrot.slane %v197_v36, 7  ;;  %v207_v47 = vrot.slane %v196_v28, 7  ;;  %v143_v48 = vrot.slane %v142_v39, 2  ;;  %v81_v50 = vadd.f32 %v80_v41, %v79_v31  ;;  %s1154_s17 = sld [smem:[#allocation4 + $0x2]]  ;;  %s1157_s25 = sld [smem:[#allocation4 + $0x5]] }
  0x39   :  { %66 = vst.msk [vmem:[#allocation2] ss:$8 sm:$0x3] %vm1393_vm1, %v61_v38  ;;  %v150_v49 = vrot.slane %v149_v40, 2  ;;  %v208_v51 = vrot.slane %v198_v37, 7  ;;  %v88_v52 = vadd.f32 %v87_v44, %v86_v32  ;;  %v280_v55 = vmul.f32 %v278_v43, %v278_v43  ;;  %s1078_s26 = sld [smem:[#allocation5]] }
  0x3a   :  { %v206_v53 = vsel %vm203_vm0, %v204_v45, %v205_v46  ;;  %v144_v56 = vadd.f32 %v143_v48, %v142_v39  ;;  %v82_v58 = vrot.slane %v81_v50, 2  ;;  %v241_v63 = vstv %s1404_s2  ;;  %v1468_v38 = vld [vmem:[#allocation9 + $0x10] sm:$0x1c]  ;;  %p886_p5 = scmp.gt.s32.totalorder %s1404_s2, 1  ;;  %p918_p6 = scmp.gt.s32.totalorder %s1438_s12, 1 }
  0x3b   :  { %v151_v57 = vadd.f32 %v150_v49, %v149_v40  ;;  %v209_v59 = vsel %vm203_vm0, %v207_v47, %v208_v51  ;;  %v89_v60 = vrot.slane %v88_v52, 2  ;;  %v212_v61 = vsel %vm78_vm2, %v206_v53, 0.0  ;;  %v1474_v40 = vld [vmem:[#allocation9 + $0x18] sm:$0x1c]  ;;  %s1160_s0 = sld [smem:[#allocation5 + $0x1]]  ;;  %s1161_s28 = sld [smem:[#allocation5 + $0x2]] }
  0x3c   :  { %v219_v62 = vsel %vm78_vm2, %v209_v59, 0.0  ;;  %v145_v0 = vrot.slane %v144_v56, 1  ;;  %v83_v4 = vadd.f32 %v82_v58, %v81_v50  ;;  %v213_v5 = vrot.slane %v212_v61, 4  ;;  %s1789_s2 = smov (!%p886_p5, %s1404_s2), 1  ;;  %p982_p8 = scmp.gt.s32.totalorder %s1708_s13, 1 }
  0x3d   :  { %v152_v2 = vrot.slane %v151_v57, 1  ;;  %v1422_v6 = vsub.s32 1, %v1397_v16  ;;  %v90_v7 = vadd.f32 %v89_v60, %v88_v52  ;;  %v220_v8 = vrot.slane %v219_v62, 4  ;;  %p790_p2 = scmp.gt.s32.totalorder %s789_s14, 1  ;;  %p822_p3 = scmp.gt.s32.totalorder %s1153_s16, 1 }
  0x3e   :  { %v283_v9 = vrot.slane %v279_v54, 4  ;;  %v1424_v11 = vadd.f32 %v145_v0, %v144_v56  ;;  %vm1429_vm3 = vcmp.lt.s32.totalorder %v1399_v19, %v241_v63  ;;  %vm1434_vm4 = vcmp.lt.s32.totalorder %v1412_v35, %v241_v63  ;;  %p854_p4 = scmp.gt.s32.totalorder %s1154_s17, 1  ;;  %s888_s20 = scvt.s32.f32 %s1789_s2 }
  0x3f   :  { %v1426_v12 = vadd.f32 %v152_v2, %v151_v57  ;;  %v84_v17 = vrot.slane %v83_v4, 1  ;;  %v91_v18 = vrot.slane %v90_v7, 1  ;;  %v214_v21 = vadd.f32 %v213_v5, %v212_v61  ;;  %s1783_s14 = smov (!%p790_p2, %s789_s14), 1  ;;  %s1785_s16 = smov (!%p822_p3, %s1153_s16), 1 }
  0x40   :  { %v765_v15 = vld [vmem:[#allocation2] ss:$8 sm:$0x3]  ;;  %v221_v22 = vadd.f32 %v220_v8, %v219_v62  ;;  %1216 = vrsqrt.f32 %v1424_v11  ;;  %v284_v25 = vrot.slane %v280_v55, 4  ;;  %v1446_v26 = vsub.s32 %v114_v20, %v1397_v16  ;;  %s792_s15 = scvt.s32.f32 %s1783_s14  ;;  %s1787_s17 = smov (!%p854_p4, %s1154_s17), 1 }
  0x41   :  { %v770_v23 = vrot.slane %v765_v15, %v1409_v34  ;;  %v774_v24 = vrot.slane %v765_v15, %v1422_v6  ;;  %1218 = vrsqrt.f32 %v1426_v12  ;;  %v1454_v29 = vsel %vm1429_vm3, 1.0, %v1337_v1  ;;  %s824_s18 = scvt.s32.f32 %s1785_s16  ;;  %s856_s19 = scvt.s32.f32 %s1787_s17 }
  0x42   :  { %v1459_v30 = vsel %vm1434_vm4, 1.0, %v1337_v1  ;;  %v1461_v3 = vadd.f32 %v84_v17, %v83_v4  ;;  %v1463_v20 = vadd.f32 %v91_v18, %v90_v7  ;;  %v215_v32 = vrot.slane %v214_v21, 2  ;;  %p950_p7 = scmp.gt.s32.totalorder %s1157_s25, 1  ;;  %s1162_s2 = sld [smem:[#allocation5 + $0x3]] }
  0x43   :  { %v777_v27 = vsel %vm203_vm0, %v770_v23, 0.0  ;;  %v778_v28 = vsel %vm203_vm0, %v774_v24, 0.0  ;;  %vm156_vm5 = vcmp.eq.f32.partialorder %v1424_v11, inf  ;;  %v222_v33 = vrot.slane %v221_v22, 2  ;;  %s1163_s17 = sld [smem:[#allocation5 + $0x4]] }
  0x44   :  { %v779_v31 = vadd.f32 %v778_v28, %v777_v27  ;;  %v287_v36 = vsel %vm78_vm2, %v283_v9, 0.0  ;;  %v294_v37 = vsel %vm78_vm2, %v284_v25, 0.0  ;;  %vm158_vm6 = vcmp.eq.f32.partialorder %v1424_v11, 0.0  ;;  %s1793_s25 = smov (!%p950_p7, %s1157_s25), 1 }
  0x45   :  { %v159_v39 = vand.u32 2147483648, %v1424_v11  ;;  %vm163_vm7 = vcmp.eq.f32.partialorder %v1426_v12, inf  ;;  %1220 = vrsqrt.f32 %v1461_v3  ;;  %vm165_vm8 = vcmp.eq.f32.partialorder %v1426_v12, 0.0  ;;  %s952_s27 = scvt.s32.f32 %s1793_s25 }
  0x46   :  { %780 = vadd.xlane.f32.xlu0 %v779_v31  ;;  %v166_v41 = vand.u32 2147483648, %v1426_v12  ;;  %1222 = vrsqrt.f32 %v1463_v20  ;;  %v316_v42 = vstv %s1438_s12  ;;  %vm95_vm9 = vcmp.eq.f32.partialorder %v1461_v3, inf  ;;  %s1791_s12 = smov (!%p918_p6, %s1438_s12), 1 }
  0x47   :  { %v216_v43 = vadd.f32 %v215_v32, %v214_v21  ;;  %v223_v44 = vadd.f32 %v222_v33, %v221_v22  ;;  %v288_v45 = vrot.slane %v287_v36, 4  ;;  %v295_v46 = vrot.slane %v294_v37, 4  ;;  %s920_s21 = scvt.s32.f32 %s1791_s12 }
  0x48   :  { %vm97_vm10 = vcmp.eq.f32.partialorder %v1461_v3, 0.0  ;;  %v98_v47 = vand.u32 2147483648, %v1461_v3  ;;  %v358_v48 = vmul.f32 %v1468_v38, %v1468_v38  ;;  %v359_v49 = vmul.f32 %v1474_v40, %v1474_v40 }
  0x49   :  { %v217_v50 = vrot.slane %v216_v43, 1  ;;  %v224_v51 = vrot.slane %v223_v44, 1  ;;  %v289_v52 = vadd.f32 %v288_v45, %v287_v36  ;;  %v296_v53 = vadd.f32 %v295_v46, %v294_v37  ;;  %v1533_v36 = vld [vmem:[#allocation9 + $0x10] sm:$0xe0] }
  0x4a   :  { %v1217_v54 = vpop.eup %1216  ;;  %vm102_vm11 = vcmp.eq.f32.partialorder %v1463_v20, inf  ;;  %vm104_vm12 = vcmp.eq.f32.partialorder %v1463_v20, 0.0  ;;  %v362_v55 = vrot.slane %v358_v48, 2  ;;  %v363_v56 = vrot.slane %v359_v49, 2 }
  0x4b   :  { %v1219_v57 = vpop.eup %1218  ;;  %v155_v58 = vmul.f32 %v1217_v54, %v1424_v11  ;;  %v1490_v59 = vadd.f32 %v217_v50, %v216_v43  ;;  %v1492_v60 = vadd.f32 %v224_v51, %v223_v44  ;;  %vm1495_vm13 = vcmp.lt.s32.totalorder %v1399_v19, %v316_v42  ;;  %v169_v37 = vld [vmem:[#allocation2 + $0x2] ss:$8 sm:$0x3] }
  0x4c   :  { %v162_v62 = vmul.f32 %v1219_v57, %v1426_v12  ;;  %v290_v63 = vrot.slane %v289_v52, 2  ;;  %v297_v0 = vrot.slane %v296_v53, 2  ;;  %vm318_vm14 = vcmp.lt.s32.totalorder %v1412_v35, %v316_v42  ;;  %v1540_v42 = vld [vmem:[#allocation9 + $0x18] sm:$0xe0] }
  0x4d   :  { %v157_v2 = vsel %vm156_vm5, %v1424_v11, %v155_v58  ;;  %v105_v4 = vand.u32 2147483648, %v1463_v20  ;;  %1224 = vrsqrt.f32 %v1490_v59  ;;  %v366_v5 = vsel %vm78_vm2, %v362_v55, 0.0  ;;  %v108_v57 = vld [vmem:[#allocation2 + $0x1] ss:$8 sm:$0x3] }
  0x4e   :  { %v160_v7 = vsel %vm158_vm6, %v159_v39, %v157_v2  ;;  %v164_v8 = vsel %vm163_vm7, %v1426_v12, %v162_v62  ;;  %1226 = vrsqrt.f32 %v1492_v60  ;;  %v373_v9 = vsel %vm78_vm2, %v363_v56, 0.0 }
  0x4f   :  { %v1221_v13 = vpop.eup %1220  ;;  %v167_v14 = vsel %vm165_vm8, %v166_v41, %v164_v8  ;;  %vm228_vm15 = vcmp.eq.f32.partialorder %v1490_v59, inf  ;;  %v1520_v15 = vsel %vm1495_vm13, 1.0, %v1337_v1  ;;  %v1523_v11 = vsel %vm318_vm14, 1.0, %v1337_v1 }
  0x50   :  { %v1223_v17 = vpop.eup %1222  ;;  %v172_v18 = vcombine.low %v160_v7, %v167_v14  ;;  %v94_v21 = vmul.f32 %v1221_v13, %v1461_v3  ;;  %vm230_vm3 = vcmp.eq.f32.partialorder %v1490_v59, 0.0  ;;  %v291_v22 = vadd.f32 %v290_v63, %v289_v52 }
  0x51   :  { %v298_v23 = vadd.f32 %v297_v0, %v296_v53  ;;  %v101_v12 = vmul.f32 %v1223_v17, %v1463_v20  ;;  %v231_v24 = vand.u32 2147483648, %v1490_v59  ;;  %v367_v25 = vrot.slane %v366_v5, 4 }
  0x52   :  { %v374_v27 = vrot.slane %v373_v9, 4  ;;  %v179_v28 = vrot.slane %v172_v18, %v1446_v26  ;;  %v96_v31 = vsel %vm95_vm9, %v1461_v3, %v94_v21  ;;  %v292_v32 = vrot.slane %v291_v22, 1  ;;  %v356_v18 = vld [vmem:[#allocation9 + $0x20] sm:$0x7] }
  0x53   :  { %v299_v33 = vrot.slane %v298_v23, 1  ;;  %v99_v39 = vsel %vm97_vm10, %v98_v47, %v96_v31  ;;  %v103_v41 = vsel %vm102_vm11, %v1463_v20, %v101_v12  ;;  %v368_v43 = vadd.f32 %v367_v25, %v366_v5  ;;  %v1580_v12 = vld [vmem:[#allocation9 + $0x28] sm:$0x7] }
  0x54   :  { %v375_v44 = vadd.f32 %v374_v27, %v373_v9  ;;  %v186_v45 = vrot.slane %v179_v28, %v1446_v26  ;;  %v106_v46 = vsel %vm104_vm12, %v105_v4, %v103_v41  ;;  %v1545_v48 = vadd.f32 %v292_v32, %v291_v22 }
  0x55   :  { %v1547_v49 = vadd.f32 %v299_v33, %v298_v23  ;;  %v111_v50 = vcombine.low %v99_v39, %v106_v46  ;;  %v369_v3 = vrot.slane %v368_v43, 2  ;;  %v386_v51 = vmul.f32 %v1533_v36, %v1533_v36 }
  0x56   :  { %v376_v47 = vrot.slane %v375_v44, 2  ;;  %v188_v52 = vadd.f32 %v186_v45, %v169_v37  ;;  %vm235_vm4 = vcmp.eq.f32.partialorder %v1492_v60, inf  ;;  %1228 = vrsqrt.f32 %v1545_v48 }
  0x57   :  { %v387_v53 = vmul.f32 %v1540_v42, %v1540_v42  ;;  %v1225_v20 = vpop.eup %1224  ;;  %v118_v54 = vrot.slane %v111_v50, %v1446_v26  ;;  %vm237_vm5 = vcmp.eq.f32.partialorder %v1492_v60, 0.0  ;;  %v238_v55 = vand.u32 2147483648, %v1492_v60 }
  0x58   :  { %1230 = vrsqrt.f32 %v1547_v49  ;;  %v1227_v56 = vpop.eup %1226  ;;  %189 = vst.msk [vmem:[#allocation2 + $0x2] ss:$8 sm:$0x3] %vm1393_vm1, %v188_v52  ;;  %v227_v58 = vmul.f32 %v1225_v20, %v1490_v59  ;;  %vm303_vm6 = vcmp.eq.f32.partialorder %v1545_v48, inf  ;;  %v306_v61 = vand.u32 2147483648, %v1545_v48 }
  0x59   :  { %v370_v62 = vadd.f32 %v369_v3, %v368_v43  ;;  %v125_v63 = vrot.slane %v118_v54, %v1446_v26  ;;  %v234_v0 = vmul.f32 %v1227_v56, %v1492_v60  ;;  %vm305_vm7 = vcmp.eq.f32.partialorder %v1545_v48, 0.0 }
  0x5a   :  { %vm310_vm8 = vcmp.eq.f32.partialorder %v1547_v49, inf  ;;  %v377_v2 = vadd.f32 %v376_v47, %v375_v44  ;;  %v390_v4 = vrot.slane %v386_v51, 5  ;;  %v229_v5 = vsel %vm228_vm15, %v1490_v59, %v227_v58 }
  0x5b   :  { %vm312_vm9 = vcmp.eq.f32.partialorder %v1547_v49, 0.0  ;;  %v313_v7 = vand.u32 2147483648, %v1547_v49  ;;  %v371_v8 = vrot.slane %v370_v62, 1  ;;  %v391_v9 = vrot.slane %v387_v53, 5 }
  0x5c   :  { %v127_v13 = vadd.f32 %v125_v63, %v108_v57  ;;  %v232_v14 = vsel %vm230_vm3, %v231_v24, %v229_v5  ;;  %v236_v17 = vsel %vm235_vm4, %v1492_v60, %v234_v0  ;;  %v378_v21 = vrot.slane %v377_v2, 1  ;;  %v1598_v0 = vld [vmem:[#allocation9 + $0x34] ss:$8 sm:$0x3] }
  0x5d   :  { %v239_v22 = vsel %vm237_vm5, %v238_v55, %v236_v17  ;;  %v1141_v23 = vadd.f32 -1.0, %v232_v14  ;;  %v372_v25 = vadd.f32 %v371_v8, %v370_v62  ;;  %v394_v27 = vsel %vm78_vm2, %v390_v4, 0.0  ;;  %v255_v17 = vld [vmem:[#allocation2 + $0x3] ss:$8 sm:$0x3] }
  0x5e   :  { %128 = vst.msk [vmem:[#allocation2 + $0x1] ss:$8 sm:$0x3] %vm1393_vm1, %v127_v13  ;;  %v1142_v59 = vadd.f32 -1.0, %v239_v22  ;;  %v379_v24 = vadd.f32 %v378_v21, %v377_v2  ;;  %v395_v28 = vrot.slane %v394_v27, 4  ;;  %v401_v31 = vsel %vm78_vm2, %v391_v9, 0.0 }
  0x5f   :  { %v250_v32 = vmul.f32 %v1141_v23, %v1141_v23  ;;  %v380_v33 = vadd.f32 1e-08, %v372_v25  ;;  %v402_v37 = vrot.slane %v401_v31, 4  ;;  %v414_v39 = vsub.f32 0.0, %v356_v18 }
  0x60   :  { %v829_v60 = vld [vmem:[#allocation2 + $0x2] ss:$8 sm:$0x3]  ;;  %v251_v41 = vmul.f32 %v1142_v59, %v1142_v59  ;;  %v381_v43 = vadd.f32 1e-08, %v379_v24  ;;  %v396_v44 = vadd.f32 %v395_v28, %v394_v27  ;;  %v415_v45 = vsub.f32 0.0, %v1580_v12  ;;  %v1229_v46 = vpop.eup %1228 }
  0x61   :  { %v834_v50 = vrot.slane %v829_v60, %v1409_v34  ;;  %v838_v3 = vrot.slane %v829_v60, %v1422_v6  ;;  %v252_v47 = vmul.f32 %v1454_v29, %v250_v32  ;;  %1232 = vrsqrt.f32 %v380_v33  ;;  %v681_v12 = vld [vmem:[#allocation2 + $0x7] ss:$8 sm:$0x3] }
  0x62   :  { %v1231_v51 = vpop.eup %1230  ;;  %v253_v52 = vmul.f32 %v1459_v30, %v251_v41  ;;  %v302_v53 = vmul.f32 %v1229_v46, %v1545_v48  ;;  %1234 = vrsqrt.f32 %v381_v43  ;;  %v397_v20 = vrot.slane %v396_v44, 2  ;;  %v1600_v30 = vld [vmem:[#allocation9 + $0x35] ss:$8 sm:$0x3]  ;;  %v1622_v41 = vld [vmem:[#allocation9 + $0x30] sm:$0x7] }
  0x63   :  { %v841_v54 = vsel %vm203_vm0, %v834_v50, 0.0  ;;  %v842_v55 = vsel %vm203_vm0, %v838_v3, 0.0  ;;  %v309_v56 = vmul.f32 %v1231_v51, %v1547_v49  ;;  %v403_v57 = vadd.f32 %v402_v37, %v401_v31  ;;  %v1626_v3 = vld [vmem:[#allocation9 + $0x28] sm:$0xf8] }
  0x64   :  { %v843_v58 = vadd.f32 %v842_v55, %v841_v54  ;;  %v258_v62 = vcombine.low %v252_v47, %v253_v52  ;;  %v304_v29 = vsel %vm303_vm6, %v1545_v48, %v302_v53  ;;  %v398_v63 = vadd.f32 %v397_v20, %v396_v44  ;;  %v1633_v52 = vld [vmem:[#allocation9 + $0x38] sm:$0x7] }
  0x65   :  { %v797_v2 = vld [vmem:[#allocation2 + $0x1] ss:$8 sm:$0x3]  ;;  %v307_v4 = vsel %vm305_vm7, %v306_v61, %v304_v29  ;;  %v311_v5 = vsel %vm310_vm8, %v1547_v49, %v309_v56  ;;  %v404_v8 = vrot.slane %v403_v57, 2  ;;  %v418_v9 = vrot.slane %v414_v39, 6 }
  0x66   :  { %844 = vadd.xlane.f32.xlu1 %v843_v58  ;;  %v802_v13 = vrot.slane %v797_v2, %v1409_v34  ;;  %v806_v14 = vrot.slane %v797_v2, %v1422_v6  ;;  %v265_v18 = vrot.slane %v258_v62, %v1446_v26  ;;  %v314_v21 = vsel %vm312_vm9, %v313_v7, %v311_v5  ;;  %v1619_v7 = vld [vmem:[#allocation9 + $0x20] sm:$0xf8] }
  0x67   :  { %v1146_v22 = vadd.f32 -1.0, %v307_v4  ;;  %v1147_v48 = vadd.f32 -1.0, %v314_v21  ;;  %v399_v61 = vrot.slane %v398_v63, 1  ;;  %v405_v23 = vadd.f32 %v404_v8, %v403_v57  ;;  %v330_v29 = vld [vmem:[#allocation2 + $0x4] ss:$8 sm:$0x3] }
  0x68   :  { %v809_v25 = vsel %vm203_vm0, %v802_v13, 0.0  ;;  %v810_v27 = vsel %vm203_vm0, %v806_v14, 0.0  ;;  %v272_v59 = vrot.slane %v265_v18, %v1446_v26  ;;  %v1617_v24 = vmul.f32 %v1600_v30, %v1598_v0 }
  0x69   :  { %v811_v28 = vadd.f32 %v810_v27, %v809_v25  ;;  %v325_v31 = vmul.f32 %v1146_v22, %v1146_v22  ;;  %v326_v32 = vmul.f32 %v1147_v48, %v1147_v48  ;;  %v400_v49 = vadd.f32 %v399_v61, %v398_v63 }
  0x6a   :  { %v274_v33 = vadd.f32 %v272_v59, %v255_v17  ;;  %v406_v37 = vrot.slane %v405_v23, 1  ;;  %v419_v39 = vrot.slane %v415_v45, 6  ;;  %v682_v60 = vadd.f32 %v681_v12, %v1617_v24 }
  0x6b   :  { %v1233_v43 = vpop.eup %1232  ;;  %812 = vadd.xlane.f32.xlu0 %v811_v28  ;;  %v327_v44 = vmul.f32 %v1520_v15, %v325_v31  ;;  %v328_v46 = vmul.f32 %v1523_v11, %v326_v32  ;;  %v408_v50 = vadd.f32 1e-08, %v400_v49  ;;  %vm536_vm10 = vcmask 1047555  }
  0x6c   :  { %v1235_v47 = vpop.eup %1234  ;;  %275 = vst.msk [vmem:[#allocation2 + $0x3] ss:$8 sm:$0x3] %vm1393_vm1, %v274_v33  ;;  %v384_v45 = vmul.f32 %v1233_v43, %v1468_v38  ;;  %v407_v51 = vadd.f32 %v406_v37, %v405_v23  ;;  %683 = vst.msk [vmem:[#allocation2 + $0x7] ss:$8 sm:$0x3] %vm1393_vm1, %v682_v60 }
  0x6d   :  { %v537_v15 = vsel %vm536_vm10, %v1619_v7, -inf  ;;  %v333_v53 = vcombine.low %v327_v44, %v328_v46  ;;  %v1637_v11 = vmul.f32 %v1235_v47, %v1474_v40  ;;  %1236 = vrsqrt.f32 %v408_v50  ;;  %v534_v23 = vld [vmem:[#allocation9 + $0x33] ss:$8 sm:$0x3] }
  0x6e   :  { %v538_v20 = vsel %vm78_vm2, %v1622_v41, -inf  ;;  %v409_v54 = vadd.f32 1e-08, %v407_v51  ;;  %v422_v55 = vmul.f32 %v418_v9, %v384_v45  ;;  %v546_v38 = vsel %vm536_vm10, %v1626_v3, -inf }
  0x6f   :  { %v539_v56 = vmax.f32 %v537_v15, %v538_v20  ;;  %v340_v57 = vrot.slane %v333_v53, %v1446_v26  ;;  %v423_v58 = vmul.f32 %v419_v39, %v1637_v11  ;;  %v547_v62 = vsel %vm78_vm2, %v1633_v52, -inf }
  0x70   :  { %1238 = vrsqrt.f32 %v409_v54  ;;  %v426_v40 = vrot.slane %v422_v55, 2  ;;  %v548_v2 = vmax.f32 %v546_v38, %v547_v62  ;;  %v1168_v39 = vtrunc.f32 %v534_v23 }
  0x71   :  { %v540_v63 = vrot.slane %v539_v56, 4  ;;  %v347_v4 = vrot.slane %v340_v57, %v1446_v26  ;;  %v427_v5 = vrot.slane %v423_v58, 2  ;;  %vm571_vm11 = vcmask 1044480  }
  0x72   :  { %v430_v8 = vsel %vm78_vm2, %v426_v40, 0.0  ;;  %v549_v13 = vrot.slane %v548_v2, 4  ;;  %v1657_v53 = vcvt.f32.s32 %v1168_v39  ;;  %vm716_vm14 = vcmask 1041408  }
  0x73   :  { %v541_v9 = vmax.f32 %v539_v56, %v540_v63  ;;  %v861_v14 = vld [vmem:[#allocation2 + $0x3] ss:$8 sm:$0x3]  ;;  %v349_v17 = vadd.f32 %v347_v4, %v330_v29  ;;  %v431_v18 = vrot.slane %v430_v8, 4  ;;  %v437_v21 = vsel %vm78_vm2, %v427_v5, 0.0 }
  0x74   :  { %v866_v22 = vrot.slane %v861_v14, %v1409_v34  ;;  %v870_v48 = vrot.slane %v861_v14, %v1422_v6  ;;  %v438_v61 = vrot.slane %v437_v21, 4  ;;  %v550_v27 = vmax.f32 %v548_v2, %v549_v13 }
  0x75   :  { %v542_v12 = vrot.slane %v541_v9, 2  ;;  %350 = vst.msk [vmem:[#allocation2 + $0x4] ss:$8 sm:$0x3] %vm1393_vm1, %v349_v17  ;;  %v432_v25 = vadd.f32 %v431_v18, %v430_v8 }
  0x76   :  { %v873_v59 = vsel %vm203_vm0, %v866_v22, 0.0  ;;  %v874_v28 = vsel %vm203_vm0, %v870_v48, 0.0  ;;  %v439_v31 = vadd.f32 %v438_v61, %v437_v21  ;;  %v551_v46 = vrot.slane %v550_v27, 2 }
  0x77   :  { %v543_v32 = vmax.f32 %v541_v9, %v542_v12  ;;  %v1237_v49 = vpop.eup %1236  ;;  %v875_v33 = vadd.f32 %v874_v28, %v873_v59  ;;  %v433_v37 = vrot.slane %v432_v25, 2 }
  0x78   :  { %v412_v60 = vmul.f32 %v1237_v49, %v1533_v36  ;;  %v440_v44 = vrot.slane %v439_v31, 2  ;;  %v552_v20 = vmax.f32 %v550_v27, %v551_v46 }
  0x79   :  { %v544_v43 = vrot.slane %v543_v32, 1  ;;  %876 = vadd.xlane.f32.xlu1 %v875_v33  ;;  %v434_v47 = vadd.f32 %v433_v37, %v432_v25 }
  0x7a   :  { %v1239_v50 = vpop.eup %1238  ;;  %v450_v51 = vrot.slane %v412_v60, 3  ;;  %v441_v58 = vadd.f32 %v440_v44, %v439_v31  ;;  %v553_v2 = vrot.slane %v552_v20, 1 }
  0x7b   :  { %v413_v15 = vmul.f32 %v1239_v50, %v1540_v42  ;;  %v1659_v38 = vmax.f32 %v543_v32, %v544_v43  ;;  %v435_v29 = vrot.slane %v434_v47, 1 }
  0x7c   :  { %v893_v54 = vld [vmem:[#allocation2 + $0x4] ss:$8 sm:$0x3]  ;;  %v454_v55 = vsub.f32 %v384_v45, %v450_v51  ;;  %v478_v56 = vmul.f32 %v450_v51, %v384_v45  ;;  %v603_v45 = vrot.slane %v1657_v53, %v1409_v34  ;;  %v442_v17 = vrot.slane %v441_v58, 1 }
  0x7d   :  { %v898_v57 = vrot.slane %v893_v54, %v1409_v34  ;;  %v902_v36 = vrot.slane %v893_v54, %v1422_v6  ;;  %v451_v62 = vrot.slane %v413_v15, 3  ;;  %v555_v14 = vsub.f32 %v1619_v7, %v1659_v38 }
  0x7e   :  { %v456_v40 = vand.u32 2147483647, %v454_v55  ;;  %v482_v63 = vrot.slane %v478_v56, 2  ;;  %v1672_v22 = vmax.f32 %v552_v20, %v553_v2  ;;  %v436_v48 = vadd.f32 %v435_v29, %v434_v47 }
  0x7f   :  { %v905_v42 = vsel %vm203_vm0, %v898_v57, 0.0  ;;  %v906_v4 = vsel %vm203_vm0, %v902_v36, 0.0  ;;  %v455_v5 = vsub.f32 %v1637_v11, %v451_v62  ;;  %v479_v13 = vmul.f32 %v451_v62, %v1637_v11 }
  0x80   :  { %v907_v8 = vadd.f32 %v906_v4, %v905_v42  ;;  %v460_v9 = vrot.slane %v456_v40, 2  ;;  %v486_v21 = vsel %vm78_vm2, %v482_v63, 0.0  ;;  %v556_v11 = vsub.f32 %v1626_v3, %v1672_v22 }
  0x81   :  { %v457_v18 = vand.u32 2147483647, %v455_v5  ;;  %v483_v23 = vrot.slane %v479_v13, 2  ;;  %v487_v12 = vrot.slane %v486_v21, 4  ;;  %v557_v59 = vsub.f32 %v1622_v41, %v1659_v38 }
  0x82   :  { %908 = vadd.xlane.f32.xlu0 %v907_v8  ;;  %v464_v61 = vsel %vm78_vm2, %v460_v9, 0.0  ;;  %v558_v32 = vsub.f32 %v1633_v52, %v1672_v22  ;;  %v559_v49 = vmul.f32 1.442695, %v555_v14  ;;  %v561_v60 = vmul.f32 1.442695, %v556_v11 }
  0x83   :  { %v461_v25 = vrot.slane %v457_v18, 2  ;;  %v465_v27 = vrot.slane %v464_v61, 4  ;;  %v488_v28 = vadd.f32 %v487_v12, %v486_v21  ;;  %v493_v31 = vsel %vm78_vm2, %v483_v23, 0.0  ;;  %v696_v18 = vld [vmem:[#allocation9 + $0x40] sm:$0xe] }
  0x84   :  { %v494_v39 = vrot.slane %v493_v31, 4  ;;  %1240 = vpow2.f32 %v559_v49  ;;  %v563_v46 = vmul.f32 1.442695, %v557_v59  ;;  %v565_v51 = vmul.f32 1.442695, %v558_v32 }
  0x85   :  { %v466_v33 = vadd.f32 %v465_v27, %v464_v61  ;;  %v471_v37 = vsel %vm78_vm2, %v461_v25, 0.0  ;;  %v489_v44 = vrot.slane %v488_v28, 2  ;;  %1242 = vpow2.f32 %v561_v60  ;;  %v688_v61 = vld [vmem:[#allocation2 + $0x10] ss:$8 sm:$0x3] }
  0x86   :  { %v472_v43 = vrot.slane %v471_v37, 4  ;;  %v495_v47 = vadd.f32 %v494_v39, %v493_v31  ;;  %1244 = vpow2.f32 %v563_v46  ;;  %v607_v54 = vrot.slane %v1657_v53, %v1422_v6  ;;  %v692_v25 = vld [vmem:[#allocation9 + $0x30] sm:$0xc0]  ;;  %v697_v27 = vld [vmem:[#allocation9 + $0x48] sm:$0xe] }
  0x87   :  { %v467_v50 = vrot.slane %v466_v33, 2  ;;  %v490_v20 = vadd.f32 %v489_v44, %v488_v28  ;;  %v443_v55 = vadd.f32 %v442_v17, %v441_v58  ;;  %1246 = vpow2.f32 %v565_v51  ;;  %v694_v28 = vld [vmem:[#allocation9 + $0x40] sm:$0x1]  ;;  %v693_v60 = vld [vmem:[#allocation9 + $0x38] sm:$0xc0] }
  0x88   :  { %v473_v15 = vadd.f32 %v472_v43, %v471_v37  ;;  %v496_v57 = vrot.slane %v495_v47, 2  ;;  %v618_v29 = vrot.slane %v1619_v7, 3  ;;  %v444_v40 = vmax.f32 %v436_v48, 0.0 }
  0x89   :  { %v468_v56 = vadd.f32 %v467_v50, %v466_v33  ;;  %v491_v62 = vrot.slane %v490_v20, 1  ;;  %v619_v42 = vrot.slane %v1622_v41, 3  ;;  %vm608_vm12 = vcmp.eq.s32.totalorder %v1397_v16, %v603_v45 }
  0x8a   :  { %v474_v36 = vrot.slane %v473_v15, 2  ;;  %v497_v2 = vadd.f32 %v496_v57, %v495_v47  ;;  %v685_v53 = vadd.f32 %v1600_v30, %v1598_v0  ;;  %v445_v58 = vmax.f32 %v443_v55, 0.0 }
  0x8b   :  { %v469_v63 = vrot.slane %v468_v56, 1  ;;  %v492_v5 = vadd.f32 %v491_v62, %v490_v20  ;;  %vm609_vm13 = vcmp.eq.s32.totalorder %v1397_v16, %v607_v54  ;;  %v621_v7 = vrot.slane %v1626_v3, 3 }
  0x8c   :  { %v475_v4 = vadd.f32 %v474_v36, %v473_v15  ;;  %v498_v9 = vrot.slane %v497_v2, 1  ;;  %v622_v17 = vrot.slane %v1633_v52, 3  ;;  %v446_v41 = vmin.f32 %v444_v40, 1.0 }
  0x8d   :  { %v470_v8 = vadd.f32 %v469_v63, %v468_v56  ;;  %v500_v14 = vsub.f32 1.0, %v492_v5  ;;  %v1148_v48 = vsel %vm608_vm12, 1.0, %v1337_v1  ;;  %v620_v45 = vsel %vm571_vm11, %v618_v29, %v619_v42 }
  0x8e   :  { %v476_v13 = vrot.slane %v475_v4, 1  ;;  %v499_v21 = vadd.f32 %v498_v9, %v497_v2  ;;  %v1241_v0 = vpop.eup %1240  ;;  %v1149_v12 = vsel %vm609_vm13, 1.0, %v1337_v1  ;;  %v686_v16 = vsub.f32 %v685_v53, %v1617_v24  ;;  %v695_v24 = vld [vmem:[#allocation9 + $0x48] sm:$0x1] }
  0x8f   :  { %v502_v23 = vadd.f32 %v500_v14, %v470_v8  ;;  %v1243_v3 = vpop.eup %1242  ;;  %v447_v11 = vmin.f32 %v445_v58, 1.0  ;;  %v572_v59 = vrot.slane %v1241_v0, 3  ;;  %v700_v31 = vrot.slane %v696_v18, 3  ;;  %v507_v8 = vld [vmem:[#allocation2 + $0x5] ss:$8 sm:$0x3] }
  0x90   :  { %v477_v30 = vadd.f32 %v476_v13, %v475_v4  ;;  %v501_v52 = vsub.f32 1.0, %v499_v21  ;;  %v1245_v32 = vpop.eup %1244  ;;  %v575_v49 = vrot.slane %v1243_v3, 3  ;;  %v623_v33 = vsel %vm571_vm11, %v621_v7, %v622_v17 }
  0x91   :  { %v626_v37 = vmul.f32 %v1148_v48, %v620_v45  ;;  %v689_v39 = vadd.f32 %v688_v61, %v686_v16  ;;  %v1247_v43 = vpop.eup %1246  ;;  %v504_v46 = vmul.f32 %v502_v23, %v446_v41  ;;  %v573_v50 = vrot.slane %v1245_v32, 3 }
  0x92   :  { %v503_v44 = vadd.f32 %v501_v52, %v477_v30  ;;  %v701_v47 = vrot.slane %v697_v27, 3  ;;  %v576_v51 = vrot.slane %v1247_v43, 3  ;;  %v704_v15 = vsub.f32 %v692_v25, %v700_v31 }
  0x93   :  { %690 = vst.msk [vmem:[#allocation2 + $0x10] ss:$8 sm:$0x3] %vm1393_vm1, %v689_v39  ;;  %v706_v20 = vsub.f32 %v694_v28, %v700_v31  ;;  %v574_v55 = vsel %vm571_vm11, %v572_v59, %v573_v50  ;;  %v627_v56 = vmul.f32 %v1149_v12, %v623_v33  ;;  %v628_v2 = vrot.slane %v626_v37, 4 }
  0x94   :  { %v505_v54 = vmul.f32 %v503_v44, %v447_v11  ;;  %v705_v57 = vsub.f32 %v693_v60, %v701_v47  ;;  %v577_v36 = vsel %vm571_vm11, %v575_v49, %v576_v51  ;;  %v580_v62 = vrot.slane %v574_v55, 4  ;;  %v989_v49 = vld [vmem:[#allocation2 + $0x7] ss:$8 sm:$0x3] }
  0x95   :  { %v707_v29 = vsub.f32 %v695_v24, %v701_v47  ;;  %v586_v63 = vrot.slane %v577_v36, 4  ;;  %v708_v42 = vmul.f32 %v704_v15, %v704_v15  ;;  %v710_v53 = vmul.f32 %v706_v20, %v706_v20 }
  0x96   :  { %v510_v40 = vcombine.low %v504_v46, %v505_v54  ;;  %v581_v4 = vadd.f32 %v580_v62, %v574_v55  ;;  %v709_v5 = vmul.f32 %v705_v57, %v705_v57  ;;  %v634_v14 = vrot.slane %v627_v56, 4 }
  0x97   :  { %v711_v58 = vmul.f32 %v707_v29, %v707_v29  ;;  %v587_v13 = vadd.f32 %v586_v63, %v577_v36  ;;  %v717_v17 = vrot.slane %v708_v42, 6  ;;  %v718_v18 = vrot.slane %v710_v53, 6 }
  0x98   :  { %v517_v9 = vrot.slane %v510_v40, %v1446_v26  ;;  %v582_v7 = vrot.slane %v581_v4, 2  ;;  %v720_v41 = vrot.slane %v709_v5, 6  ;;  %v629_v0 = vadd.f32 %v628_v2, %v626_v37 }
  0x99   :  { %v588_v48 = vrot.slane %v587_v13, 2  ;;  %v721_v45 = vrot.slane %v711_v58, 6  ;;  %v719_v30 = vsel %vm716_vm14, %v717_v17, %v718_v18  ;;  %v635_v3 = vadd.f32 %v634_v14, %v627_v56 }
  0x9a   :  { %v524_v21 = vrot.slane %v517_v9, %v1446_v26  ;;  %v583_v61 = vadd.f32 %v582_v7, %v581_v4  ;;  %v725_v25 = vsel %vm78_vm2, %v719_v30, 0.0  ;;  %v630_v37 = vrot.slane %v629_v0, 2 }
  0x9b   :  { %v589_v12 = vadd.f32 %v588_v48, %v587_v13  ;;  %v722_v16 = vsel %vm716_vm14, %v720_v41, %v721_v45  ;;  %v726_v11 = vrot.slane %v725_v25, 4  ;;  %v636_v39 = vrot.slane %v635_v3, 2  ;;  %v740_v48 = vld [vmem:[#allocation2 + $0x11] ss:$8 sm:$0x3] }
  0x9c   :  { %v526_v23 = vadd.f32 %v524_v21, %v507_v8  ;;  %v584_v27 = vrot.slane %v583_v61, 1  ;;  %v732_v59 = vsel %vm78_vm2, %v722_v16, 0.0  ;;  %v994_v44 = vrot.slane %v989_v49, %v1409_v34 }
  0x9d   :  { %v590_v52 = vrot.slane %v589_v12, 1  ;;  %v727_v31 = vadd.f32 %v726_v11, %v725_v25  ;;  %v733_v32 = vrot.slane %v732_v59, 4  ;;  %v998_v24 = vrot.slane %v989_v49, %v1422_v6 }
  0x9e   :  { %527 = vst.msk [vmem:[#allocation2 + $0x5] ss:$8 sm:$0x3] %vm1393_vm1, %v526_v23  ;;  %v585_v28 = vadd.f32 %v584_v27, %v583_v61  ;;  %v631_v47 = vadd.f32 %v630_v37, %v629_v0  ;;  %v637_v15 = vadd.f32 %v636_v39, %v635_v3  ;;  %v1001_v57 = vsel %vm203_vm0, %v994_v44, 0.0 }
  0x9f   :  { %v591_v33 = vadd.f32 %v590_v52, %v589_v12  ;;  %v728_v60 = vrot.slane %v727_v31, 2  ;;  %v734_v43 = vadd.f32 %v733_v32, %v732_v59  ;;  %v1002_v63 = vsel %vm203_vm0, %v998_v24, 0.0  ;;  %v653_v27 = vld [vmem:[#allocation2 + $0x6] ss:$8 sm:$0x3] }
  0xa0   :  { %1248 = vlog2.f32 %v585_v28  ;;  %v632_v2 = vrot.slane %v631_v47, 1  ;;  %v638_v4 = vrot.slane %v637_v15, 1  ;;  %v641_v5 = vstv %s1708_s13  ;;  %v1013_v32 = vld [vmem:[#allocation2 + $0x10] ss:$8 sm:$0x3]  ;;  %s1795_s13 = smov (!%p982_p8, %s1708_s13), 1 }
  0xa1   :  { %1250 = vlog2.f32 %v591_v33  ;;  %v729_v46 = vadd.f32 %v728_v60, %v727_v31  ;;  %v735_v50 = vrot.slane %v734_v43, 2  ;;  %v1003_v8 = vadd.f32 %v1002_v63, %v1001_v57 }
  0xa2   :  { %v633_v7 = vadd.f32 %v632_v2, %v631_v47  ;;  %vm642_vm2 = vcmp.lt.s32.totalorder %v1399_v19, %v641_v5  ;;  %v639_v18 = vadd.f32 %v638_v4, %v637_v15  ;;  %vm643_vm15 = vcmp.lt.s32.totalorder %v1412_v35, %v641_v5 }
  0xa3   :  { %v730_v20 = vrot.slane %v729_v46, 1  ;;  %v736_v54 = vadd.f32 %v735_v50, %v734_v43  ;;  %v1151_v61 = vsel %vm642_vm2, 1.0, %v1337_v1  ;;  %v1152_v30 = vsel %vm643_vm15, 1.0, %v1337_v1 }
  0xa4   :  { %v1018_v49 = vrot.slane %v1013_v32, %v1409_v34  ;;  %v793_v24 = vstv %s792_s15  ;;  %v857_v63 = vstv %s856_s19 }
  0xa5   :  { %v925_v51 = vld [vmem:[#allocation2 + $0x5] ss:$8 sm:$0x3]  ;;  %v731_v36 = vadd.f32 %v730_v20, %v729_v46  ;;  %v737_v62 = vrot.slane %v736_v54, 1  ;;  %1252 = vrcp.f32 %v793_v24 }
  0xa6   :  { %v930_v55 = vrot.slane %v925_v51, %v1409_v34  ;;  %v934_v56 = vrot.slane %v925_v51, %v1422_v6  ;;  %v1025_v43 = vsel %vm203_vm0, %v1018_v49, 0.0 }
  0xa7   :  { %v738_v53 = vadd.f32 %v737_v62, %v736_v54  ;;  %v825_v62 = vstv %s824_s18 }
  0xa8   :  { %v937_v29 = vsel %vm203_vm0, %v930_v55, 0.0  ;;  %v938_v40 = vsel %vm203_vm0, %v934_v56, 0.0  ;;  %1254 = vrcp.f32 %v825_v62 }
  0xa9   :  { %v939_v42 = vadd.f32 %v938_v40, %v937_v29  ;;  %v743_v9 = vcombine.low %v731_v36, %v738_v53  ;;  %1256 = vrcp.f32 %v857_v63 }
  0xaa   :  { %v1249_v58 = vpop.eup %1248 }
  0xab   :  { %940 = vadd.xlane.f32.xlu1 %v939_v42  ;;  %v1251_v13 = vpop.eup %1250  ;;  %v593_v14 = vmul.f32 0.6931472, %v1249_v58  ;;  %v750_v41 = vrot.slane %v743_v9, %v1446_v26 }
  0xac   :  { %v595_v17 = vmul.f32 0.6931472, %v1251_v13 }
  0xad   :  { %v596_v21 = vadd.f32 %v593_v14, %v1659_v38  ;;  %v757_v0 = vrot.slane %v750_v41, %v1446_v26 }
  0xae   :  { %v597_v45 = vadd.f32 %v595_v17, %v1672_v22 }
  0xaf   :  { %1004 = vadd.xlane.f32.xlu1 %v1003_v8  ;;  %v648_v23 = vsub.f32 %v596_v21, %v633_v7  ;;  %v759_v12 = vadd.f32 %v757_v0, %v740_v48  ;;  %v1253_v54 = vpop.eup %1252  ;;  %v889_v7 = vstv %s888_s20 }
  0xb0   :  { %v649_v19 = vsub.f32 %v597_v45, %v639_v18  ;;  %1258 = vrcp.f32 %v889_v7 }
  0xb1   :  { %v650_v16 = vmul.f32 %v1151_v61, %v648_v23  ;;  %760 = vst.msk [vmem:[#allocation2 + $0x11] ss:$8 sm:$0x3] %vm1393_vm1, %v759_v12  ;;  %v921_v61 = vstv %s920_s21 }
  0xb2   :  { %v651_v25 = vmul.f32 %v1152_v30, %v649_v19  ;;  %v1255_v9 = vpop.eup %1254  ;;  %1260 = vrcp.f32 %v921_v61 }
  0xb3   :  { %v1257_v17 = vpop.eup %1256 }
  0xb4   :  { %v656_v35 = vcombine.low %v650_v16, %v651_v25 }
  0xb6   :  { %v663_v38 = vrot.slane %v656_v35, %v1446_v26 }
  0xb8   :  { %v670_v22 = vrot.slane %v663_v38, %v1446_v26  ;;  %v1043_v3 = vld [vmem:[#allocation2 + $0x11] ss:$8 sm:$0x3]  ;;  %v1022_v26 = vrot.slane %v1013_v32, %v1422_v6 }
  0xb9   :  { %v1048_v52 = vrot.slane %v1043_v3, %v1409_v34  ;;  %v1052_v1 = vrot.slane %v1043_v3, %v1422_v6  ;;  %v953_v3 = vstv %s952_s27 }
  0xba   :  { %v672_v11 = vadd.f32 %v670_v22, %v653_v27  ;;  %v1026_v44 = vsel %vm203_vm0, %v1022_v26, 0.0  ;;  %v1259_v19 = vpop.eup %1258  ;;  %1262 = vrcp.f32 %v953_v3 }
  0xbb   :  { %v1055_v59 = vsel %vm203_vm0, %v1048_v52, 0.0  ;;  %v1056_v28 = vsel %vm203_vm0, %v1052_v1, 0.0  ;;  %v1027_v50 = vadd.f32 %v1026_v44, %v1025_v43 }
  0xbc   :  { %673 = vst.msk [vmem:[#allocation2 + $0x6] ss:$8 sm:$0x3] %vm1393_vm1, %v672_v11  ;;  %v1057_v31 = vadd.f32 %v1056_v28, %v1055_v59  ;;  %v1261_v27 = vpop.eup %1260 }
  0xbe   :  { %1058 = vadd.xlane.f32.xlu1 %v1057_v31 }
  0xc3   :  { %v957_v33 = vld [vmem:[#allocation2 + $0x6] ss:$8 sm:$0x3] }
  0xc4   :  { %v962_v37 = vrot.slane %v957_v33, %v1409_v34  ;;  %v966_v39 = vrot.slane %v957_v33, %v1422_v6  ;;  %v1263_v32 = vpop.eup %1262 }
  0xc6   :  { %v969_v10 = vsel %vm203_vm0, %v962_v37, 0.0  ;;  %v970_v60 = vsel %vm203_vm0, %v966_v39, 0.0 }
  0xc7   :  { %v971_v46 = vadd.f32 %v970_v60, %v969_v10 }
  0xc9   :  { %972 = vadd.xlane.f32.xlu0 %v971_v46 }
  0xcd   :  { %1028 = vadd.xlane.f32.xlu0 %v1027_v50 }
  0xd3   :  { %v781_v47 = vpop.xlane.xlu0 %780 }
  0xd4   :  { %v782_v51 = vrot.slane %v781_v47, 4 }
  0xd6   :  { %v783_v34 = vadd.f32 %v782_v51, %v781_v47 }
  0xd8   :  { %v784_v6 = vrot.slane %v783_v34, 2 }
  0xda   :  { %v785_v15 = vadd.f32 %v784_v6, %v783_v34 }
  0xdc   :  { %v786_v20 = vrot.slane %v785_v15, 1 }
  0xde   :  { %v787_v55 = vadd.f32 %v786_v20, %v785_v15 }
  0xe0   :  { %1170 = vpush %v787_v55 }
  0xe1   :  { %1172 = vpush %v1253_v54 }
  0xf3   :  { %v845_v56 = vpop.xlane.xlu1 %844 }
  0xf4   :  { %v846_v57 = vrot.slane %v845_v56, 4 }
  0xf6   :  { %v847_v36 = vadd.f32 %v846_v57, %v845_v56 }
  0xf8   :  { %v848_v29 = vrot.slane %v847_v36, 2  ;;  %v813_v40 = vpop.xlane.xlu0 %812 }
  0xf9   :  { %v814_v2 = vrot.slane %v813_v40, 4 }
  0xfa   :  { %v849_v4 = vadd.f32 %v848_v29, %v847_v36 }
  0xfb   :  { %v815_v42 = vadd.f32 %v814_v2, %v813_v40 }
  0xfc   :  { %v850_v58 = vrot.slane %v849_v4, 1 }
  0xfd   :  { %v816_v5 = vrot.slane %v815_v42, 2 }
  0xfe   :  { %v851_v14 = vadd.f32 %v850_v58, %v849_v4 }
  0xff   :  { %v817_v53 = vadd.f32 %v816_v5, %v815_v42 }
 0x101   :  { %v818_v8 = vrot.slane %v817_v53, 1 }
 0x103   :  { %v819_v13 = vadd.f32 %v818_v8, %v817_v53 }
 0x105   :  { %1174 = vpush %v819_v13 }
 0x106   :  { %v877_v18 = vpop.xlane.xlu1 %876  ;;  %1176 = vpush %v1255_v9 }
 0x107   :  { %v878_v41 = vrot.slane %v877_v18, 4  ;;  %1178 = vpush %v851_v14 }
 0x108   :  { %1180 = vpush %v1257_v17 }
 0x109   :  { %v879_v21 = vadd.f32 %v878_v41, %v877_v18 }
 0x10b   :  { %v880_v48 = vrot.slane %v879_v21, 2 }
 0x10d   :  { %v881_v45 = vadd.f32 %v880_v48, %v879_v21 }
 0x10f   :  { %v909_v0 = vpop.xlane.xlu0 %908  ;;  %v882_v30 = vrot.slane %v881_v45, 1 }
 0x110   :  { %v910_v23 = vrot.slane %v909_v0, 4 }
 0x111   :  { %v883_v12 = vadd.f32 %v882_v30, %v881_v45  ;;  %s1171_s22 = spop %1170 }
 0x112   :  { %v911_v16 = vadd.f32 %v910_v23, %v909_v0  ;;  %s1173_s23 = spop %1172 }
 0x113   :  { %1182 = vpush %v883_v12  ;;  %s1749_s24 = smul.f32 %s1173_s23, %s1171_s22  ;;  %s984_s23 = scvt.s32.f32 %s1795_s13 }
 0x114   :  { %v912_v25 = vrot.slane %v911_v16, 2  ;;  %1184 = vpush %v1259_v19  ;;  %s1164_s13 = sld [smem:[#allocation5 + $0x5]] }
 0x115   :  { %1077 = sst [smem:[#allocation10]] %s1749_s24  ;;  %s1079_s30 = smul.f32 %s1078_s26, %s1749_s24  ;;  %v985_v39 = vstv %s984_s23 }
 0x116   :  { %v913_v35 = vadd.f32 %v912_v25, %v911_v16  ;;  %1264 = vrcp.f32 %v985_v39 }
 0x118   :  { %v914_v38 = vrot.slane %v913_v35, 1 }
 0x11a   :  { %v915_v22 = vadd.f32 %v914_v38, %v913_v35 }
 0x11c   :  { %1186 = vpush %v915_v22 }
 0x11d   :  { %1188 = vpush %v1261_v27 }
 0x120   :  { %v1265_v54 = vpop.eup %1264 }
 0x136   :  { %s1175_s29 = spop %1174 }
 0x137   :  { %s1177_s4 = spop %1176 }
 0x138   :  { %s828_s5 = smul.f32 %s1177_s4, %s1175_s29  ;;  %s1179_s1 = spop %1178  ;;  %v941_v11 = vpop.xlane.xlu1 %940 }
 0x139   :  { %s1181_s6 = spop %1180  ;;  %v942_v52 = vrot.slane %v941_v11, 4  ;;  %s1159_s29 = sld [smem:[#allocation4 + $0x8]] }
 0x13a   :  { %1082 = sst [smem:[#allocation10 + $0x1]] %s828_s5  ;;  %s1084_s7 = smul.f32 %s1160_s0, %s828_s5 }
 0x13b   :  { %s860_s8 = smul.f32 %s1181_s6, %s1179_s1  ;;  %v943_v1 = vadd.f32 %v942_v52, %v941_v11 }
 0x13c   :  { %s1085_s9 = sadd.f32 %s1084_s7, %s1079_s30  ;;  %v1005_v26 = vpop.xlane.xlu1 %1004  ;;  %s1165_s30 = sld [smem:[#allocation5 + $0x6]] }
 0x13d   :  { %1087 = sst [smem:[#allocation10 + $0x2]] %s860_s8  ;;  %s1089_s10 = smul.f32 %s1161_s28, %s860_s8  ;;  %v944_v59 = vrot.slane %v943_v1, 2  ;;  %v1006_v33 = vrot.slane %v1005_v26, 4 }
 0x13f   :  { %s1090_s11 = sadd.f32 %s1089_s10, %s1085_s9  ;;  %v945_v28 = vadd.f32 %v944_v59, %v943_v1  ;;  %v1007_v37 = vadd.f32 %v1006_v33, %v1005_v26  ;;  %p1068_p9 = scmp.gt.s32.totalorder %s1159_s29, 1 }
 0x141   :  { %v946_v31 = vrot.slane %v945_v28, 1  ;;  %v1008_v60 = vrot.slane %v1007_v37, 2  ;;  %s1797_s29 = smov (!%p1068_p9, %s1159_s29), 1 }
 0x142   :  { %s1070_s4 = scvt.s32.f32 %s1797_s29 }
 0x143   :  { %v947_v49 = vadd.f32 %v946_v31, %v945_v28  ;;  %v1009_v47 = vadd.f32 %v1008_v60, %v1007_v37 }
 0x144   :  { %s1183_s12 = spop %1182  ;;  %s1071_s6 = smul.f32 3.0, %s1070_s4 }
 0x145   :  { %s1185_s14 = spop %1184  ;;  %1190 = vpush %v947_v49  ;;  %v1010_v20 = vrot.slane %v1009_v47, 1 }
 0x146   :  { %s892_s15 = smul.f32 %s1185_s14, %s1183_s12  ;;  %1192 = vpush %v1263_v32  ;;  %v1072_v2 = vstv %s1071_s6  ;;  %s1166_s12 = sld [smem:[#allocation5 + $0x7]] }
 0x147   :  { %v1011_v57 = vadd.f32 %v1010_v20, %v1009_v47  ;;  %1266 = vrcp.f32 %v1072_v2  ;;  %s1167_s14 = sld [smem:[#allocation5 + $0x8]] }
 0x148   :  { %1092 = sst [smem:[#allocation10 + $0x3]] %s892_s15  ;;  %s1094_s16 = smul.f32 %s1162_s2, %s892_s15 }
 0x14a   :  { %s1095_s18 = sadd.f32 %s1094_s16, %s1090_s11 }
 0x14b   :  { %v1059_v29 = vpop.xlane.xlu1 %1058 }
 0x14c   :  { %v1060_v40 = vrot.slane %v1059_v29, 4 }
 0x14d   :  { %s1187_s19 = spop %1186 }
 0x14e   :  { %s1189_s20 = spop %1188  ;;  %v1061_v63 = vadd.f32 %v1060_v40, %v1059_v29 }
 0x14f   :  { %s924_s21 = smul.f32 %s1189_s20, %s1187_s19 }
 0x150   :  { %v1062_v42 = vrot.slane %v1061_v63, 2 }
 0x151   :  { %1097 = sst [smem:[#allocation10 + $0x4]] %s924_s21  ;;  %s1099_s22 = smul.f32 %s1163_s17, %s924_s21  ;;  %v1267_v58 = vpop.eup %1266 }
 0x152   :  { %v1063_v5 = vadd.f32 %v1062_v42, %v1061_v63 }
 0x153   :  { %s1755_s24 = sadd.f32 %s1099_s22, %s1095_s18 }
 0x154   :  { %v1064_v53 = vrot.slane %v1063_v5, 1 }
 0x156   :  { %v973_v10 = vpop.xlane.xlu0 %972  ;;  %v1065_v9 = vadd.f32 %v1064_v53, %v1063_v5 }
 0x157   :  { %v974_v43 = vrot.slane %v973_v10, 4 }
 0x159   :  { %v975_v44 = vadd.f32 %v974_v43, %v973_v10 }
 0x15a   :  { %v1029_v46 = vpop.xlane.xlu0 %1028 }
 0x15b   :  { %v976_v50 = vrot.slane %v975_v44, 2  ;;  %v1030_v24 = vrot.slane %v1029_v46, 4 }
 0x15d   :  { %v1031_v51 = vadd.f32 %v1030_v24, %v1029_v46  ;;  %v977_v34 = vadd.f32 %v976_v50, %v975_v44 }
 0x15f   :  { %v1032_v6 = vrot.slane %v1031_v51, 2  ;;  %v978_v15 = vrot.slane %v977_v34, 1 }
 0x161   :  { %v1033_v55 = vadd.f32 %v1032_v6, %v1031_v51  ;;  %v979_v56 = vadd.f32 %v978_v15, %v977_v34 }
 0x163   :  { %1194 = vpush %v979_v56  ;;  %v1034_v36 = vrot.slane %v1033_v55, 1 }
 0x164   :  { %1196 = vpush %v1265_v54 }
 0x165   :  { %1198 = vpush %v1011_v57  ;;  %v1035_v62 = vadd.f32 %v1034_v36, %v1033_v55 }
 0x167   :  { %1200 = vpush %v1035_v62 }
 0x176   :  { %s1191_s25 = spop %1190 }
 0x177   :  { %s1193_s26 = spop %1192 }
 0x178   :  { %s956_s0 = smul.f32 %s1193_s26, %s1191_s25  ;;  %s1314_s26 = scalar_lea.hbm %s1773_s3, 16 }
 0x179   :  { %p1315_p10 = scmp.ne.s32.totalorder %s1773_s3, %s1314_s26  ;;  %p1318_p11 = scmp.lt.u32.totalorder %s1314_s26, %s1773_s3 }
 0x17a   :  { %1102 = sst [smem:[#allocation10 + $0x5]] %s956_s0  ;;  %s1104_s27 = smul.f32 %s1164_s13, %s956_s0 }
 0x17b   :  { %p1320_p12 = pnand %p1318_p11, %p1315_p10 }
 0x17c   :  { %s1105_s28 = sadd.f32 %s1104_s27, %s1755_s24 }
 0x194   :  { %s1195_s5 = spop %1194 }
 0x195   :  { %s1197_s1 = spop %1196 }
 0x196   :  { %s988_s7 = smul.f32 %s1197_s1, %s1195_s5  ;;  %s1199_s8 = spop %1198 }
 0x198   :  { %1107 = sst [smem:[#allocation10 + $0x6]] %s988_s7  ;;  %s1109_s9 = smul.f32 %s1165_s30, %s988_s7 }
 0x199   :  { %s1201_s10 = spop %1200 }
 0x19a   :  { %s1110_s11 = sadd.f32 %s1109_s9, %s1105_s28 }
 0x19b   :  { %s1037_s2 = sadd.f32 1e-08, %s1201_s10 }
 0x19d   :  { %v1038_v4 = vstv %s1037_s2 }
 0x19e   :  { %1268 = vrcp.f32 %v1038_v4 }
 0x1a8   :  { %v1269_v8 = vpop.eup %1268 }
 0x1a9   :  { %1202 = vpush %v1269_v8 }
 0x1aa   :  { %1204 = vpush %v1065_v9 }
 0x1ab   :  { %1206 = vpush %v1267_v58 }
 0x1da   :  { %s1203_s15 = spop %1202 }
 0x1db   :  { %s1041_s16 = smul.f32 %s1203_s15, %s1199_s8  ;;  %s1205_s17 = spop %1204 }
 0x1dc   :  { %s1207_s18 = spop %1206 }
 0x1dd   :  { %s1042_s19 = ssub.f32 1.0, %s1041_s16  ;;  %s1075_s20 = smul.f32 %s1207_s18, %s1205_s17 }
 0x1df   :  { %1112 = sst [smem:[#allocation10 + $0x7]] %s1042_s19  ;;  %s1114_s21 = smul.f32 %s1166_s12, %s1042_s19 }
 0x1e0   :  { %1117 = sst [smem:[#allocation10 + $0x8]] %s1075_s20  ;;  %s1119_s23 = smul.f32 %s1167_s14, %s1075_s20 }
 0x1e1   :  { %s1115_s22 = sadd.f32 %s1114_s21, %s1110_s11 }
 0x1e3   :  { %s1120_s24 = sadd.f32 %s1119_s23, %s1115_s22 }
 0x1e5   :  { %1122 = sst [smem:[#allocation10 + $0x9]] %s1120_s24 }
 0x1e6   :  { %1323 = shalt.err (!%p1320_p12)
}
 0x1e7   :  { %s1339_s30 = smov [#allocation10]  }
 0x1e8   :  { %1130 = dma.smem_to_hbm %s1339_s30, 16, %s1773_s3, [#allocation7]  }
 0x1e9   :  { %1330 = dma.done.wait [#allocation7], 16  }
 0x1ea   :  { %1331 = vsyncadd [#allocation7], 4294967280 }
 0x1eb   :  { %1134 = sfence }
 0x1ec   :  { %1135 = vsyncpa [#allocation6], 1 }
 0x1ed   :  { %1136 = vsyncpa [#allocation7], 1 }
 0x1ee   :  { %1137 = vsyncpa [#allocation8], 1 }

</bundles_post_ra>
